<compile_context>
chip_gen: v5e
topology: v5e:2x2
jax: 0.10.0
libtpu: 0.0.40
codegen_flags: <defaults>
</compile_context>

<pallas_src>
import functools

import jax
import jax.numpy as jnp
from jax.experimental import pallas as pl
from jax.experimental.pallas import tpu as pltpu

# PyTorch PairwiseDistance(p=2) default eps (added to the difference).
_PD_EPS = 1e-6
_LANE = 128


def _adaptive_margin_triplet_kernel(
    a_ref, p_ref, n_ref, gtp_ref, gtn_ref, out_ref, *, base_margin, scale_factor
):
    # Math in f32 regardless of the streamed (possibly bf16) input dtype.
    # (Optional v7x micro-opt would be to subtract in bf16 and upcast the diff
    #  once; kept f32-upcast math for exact parity with the f32 reference.)
    a = a_ref[...].astype(jnp.float32)  # (TB, D)
    p = p_ref[...].astype(jnp.float32)
    n = n_ref[...].astype(jnp.float32)

    # torch.nn.PairwiseDistance(p=2): ||x1 - x2 + eps||_2 along the last dim.
    # Reduce to a lane-dense row so the tiny per-row outputs stay full-width.
    d_ap = jnp.sqrt(jnp.sum(jnp.square(a - p + _PD_EPS), axis=-1))[None, :]  # (1,TB)
    d_an = jnp.sqrt(jnp.sum(jnp.square(a - n + _PD_EPS), axis=-1))[None, :]  # (1,TB)

    gtp = gtp_ref[...].astype(jnp.float32)  # (1, TB)
    gtn = gtn_ref[...].astype(jnp.float32)  # (1, TB)

    d_ap = d_ap * gtp
    d_an = d_an * (1.0 - gtn)
    margin = base_margin + scale_factor * (1.0 - jnp.abs(gtp - gtn))

    out_ref[...] = jnp.maximum(d_ap - d_an + margin, 0.0)


def _round_up(x, m):
    return ((x + m - 1) // m) * m


def _vmem_limits():
    # Generation-aware scoped-VMEM budget: v5e/v6e have 128 MiB physical VMEM
    # (use ~48/64 MiB), v7x only 64 MiB per TensorCore (stay at ~24/32 MiB).
    phys = 64 * 1024 * 1024  # conservative default if the query fails
    try:
        phys = int(pltpu.get_tpu_info().vmem_capacity_bytes)
    except Exception:
        pass
    if phys >= 96 * 1024 * 1024:
        limit = 64 * 1024 * 1024
    else:
        limit = 32 * 1024 * 1024
    budget = (limit * 3) // 4  # headroom for misc compiler scratch
    return budget, limit


def _choose_tile(B, D, emb_itemsize, gt_itemsize):
    budget, limit = _vmem_limits()
    # Per batch-row VMEM footprint:
    #   3 embeddings x 2 pipeline buffers in native dtype  -> 6 * D * itemsize
    #   ~3 live f32 upcast/diff temporaries in the kernel   -> 3 * D * 4
    #   gt / out row buffers (tiny)                         -> small constant
    per_row = D * (6 * emb_itemsize + 3 * 4) + 4 * gt_itemsize + 2 * 4 + 64
    tb = budget // max(per_row, 1)
    tb = max(_LANE, min(2048, (tb // _LANE) * _LANE))

    b_ceil = _round_up(B, _LANE)
    tb = min(tb, b_ceil)
    # v7x megacore: keep >=2 grid tiles whenever the batch allows, so
    # dimension_semantics=("parallel",) shards the batch across both cores.
    if b_ceil >= 2 * _LANE:
        tb = min(tb, _round_up(b_ceil // 2, _LANE))
    return tb, limit


def adaptive_margin_triplet_loss(
    anchor,
    positive,
    negative,
    gt_anchor_positive,
    gt_anchor_negative,
    *,
    base_margin=0.3,
    scale_factor=0.1,
):
    """Pallas TPU implementation of AdaptiveMarginTripletLoss.forward."""
    B, D = anchor.shape
    emb_itemsize = jnp.dtype(anchor.dtype).itemsize
    gt_itemsize = max(
        jnp.dtype(gt_anchor_positive.dtype).itemsize,
        jnp.dtype(gt_anchor_negative.dtype).itemsize,
    )

    tb, vmem_limit = _choose_tile(B, D, emb_itemsize, gt_itemsize)
    num_tiles = pl.cdiv(B, tb)
    padded_B = num_tiles * tb

    # Embeddings are streamed unpadded: the ragged final block reads some
    # unspecified tail rows whose (junk) loss lanes are discarded by the [:B]
    # slice below. Only when the whole batch is smaller than one tile
    # (B < 128) do we materialize a padded copy -- negligible cost there.
    if B < tb:
        pad = ((0, tb - B), (0, 0))
        anchor = jnp.pad(anchor, pad)
        positive = jnp.pad(positive, pad)
        negative = jnp.pad(negative, pad)

    # gt labels: tiny (B,) vectors -> lane-dense (1, padded_B) rows (cheap pad).
    gtp = jnp.pad(gt_anchor_positive.reshape(-1), (0, padded_B - B)).reshape(1, padded_B)
    gtn = jnp.pad(gt_anchor_negative.reshape(-1), (0, padded_B - B)).reshape(1, padded_B)

    kernel = functools.partial(
        _adaptive_margin_triplet_kernel,
        base_margin=float(base_margin),
        scale_factor=float(scale_factor),
    )

    bytes_accessed = 3 * B * D * emb_itemsize + 2 * B * gt_itemsize + B * 4

    loss = pl.pallas_call(
        kernel,
        out_shape=jax.ShapeDtypeStruct((1, padded_B), jnp.float32),
        grid=(num_tiles,),
        in_specs=[
            pl.BlockSpec((tb, D), lambda i: (i, 0)),
            pl.BlockSpec((tb, D), lambda i: (i, 0)),
            pl.BlockSpec((tb, D), lambda i: (i, 0)),
            pl.BlockSpec((1, tb), lambda i: (0, i)),
            pl.BlockSpec((1, tb), lambda i: (0, i)),
        ],
        out_specs=pl.BlockSpec((1, tb), lambda i: (0, i)),
        compiler_params=pltpu.CompilerParams(
            dimension_semantics=("parallel",),   # megacore sharding on v7x
            vmem_limit_bytes=vmem_limit,
        ),
        cost_estimate=pl.CostEstimate(
            flops=10 * B * D,
            transcendentals=2 * B,               # two sqrt per sample
            bytes_accessed=int(bytes_accessed),
        ),
    )(anchor, positive, negative, gtp, gtn)

    # Match torch's .squeeze() on the per-sample distances -> (B,) loss.
    return loss.reshape(padded_B)[:B]


def _reference(anchor, positive, negative, gtp, gtn, base_margin=0.3, scale_factor=0.1):
    a = anchor.astype(jnp.float32)
    p = positive.astype(jnp.float32)
    n = negative.astype(jnp.float32)
    gtp = gtp.astype(jnp.float32)
    gtn = gtn.astype(jnp.float32)
    dap = jnp.sqrt(jnp.sum((a - p + _PD_EPS) ** 2, axis=-1)) * gtp
    dan = jnp.sqrt(jnp.sum((a - n + _PD_EPS) ** 2, axis=-1)) * (1.0 - gtn)
    margin = base_margin + scale_factor * (1.0 - jnp.abs(gtp - gtn))
    return jnp.maximum(dap - dan + margin, 0.0)


if __name__ == "__main__":
    key = jax.random.PRNGKey(0)

    # Case 1: tiny batch (single padded tile), f32 path.
    B1, D1 = 10, 256
    k_a, k_p, k_n, k_gp, k_gn, key = jax.random.split(key, 6)
    a1 = jax.random.normal(k_a, (B1, D1), dtype=jnp.float32)
    p1 = jax.random.normal(k_p, (B1, D1), dtype=jnp.float32)
    n1 = jax.random.normal(k_n, (B1, D1), dtype=jnp.float32)
    gp1 = jax.random.uniform(k_gp, (B1,), dtype=jnp.float32)
    gn1 = jax.random.uniform(k_gn, (B1,), dtype=jnp.float32)

    loss1 = adaptive_margin_triplet_loss(a1, p1, n1, gp1, gn1)
    jax.block_until_ready(loss1)
    ref1 = _reference(a1, p1, n1, gp1, gn1)
    assert loss1.shape == (B1,)
    assert jnp.allclose(loss1, ref1, atol=1e-5, rtol=1e-5)

    # Case 2: multi-tile batch with a ragged final block, bf16 streaming path
    # (embeddings streamed in bf16, math in f32 inside the kernel).
    B2, D2 = 300, 128
    k_a, k_p, k_n, k_gp, k_gn, key = jax.random.split(key, 6)
    a2 = jax.random.normal(k_a, (B2, D2), dtype=jnp.float32).astype(jnp.bfloat16)
    p2 = jax.random.normal(k_p, (B2, D2), dtype=jnp.float32).astype(jnp.bfloat16)
    n2 = jax.random.normal(k_n, (B2, D2), dtype=jnp.float32).astype(jnp.bfloat16)
    gp2 = jax.random.uniform(k_gp, (B2,), dtype=jnp.float32)
    gn2 = jax.random.uniform(k_gn, (B2,), dtype=jnp.float32)

    loss2 = adaptive_margin_triplet_loss(a2, p2, n2, gp2, gn2)
    jax.block_until_ready(loss2)
    ref2 = _reference(a2, p2, n2, gp2, gn2)
    assert loss2.shape == (B2,)
    assert jnp.allclose(loss2, ref2, atol=1e-4, rtol=1e-4)

    print("KERNEL_OK")
</pallas_src>

<mosaic_0001>
module attributes {stable_mosaic.version = 11 : i64} {
  func.func @_adaptive_margin_triplet_kernel(%arg0: i32, %arg1: memref<128x256xf32, #tpu.memory_space<vmem>>, %arg2: memref<128x256xf32, #tpu.memory_space<vmem>>, %arg3: memref<128x256xf32, #tpu.memory_space<vmem>>, %arg4: memref<1x128xf32, #tpu.memory_space<vmem>>, %arg5: memref<1x128xf32, #tpu.memory_space<vmem>>, %arg6: memref<1x128xf32, #tpu.memory_space<vmem>>) attributes {dimension_semantics = [#tpu.dimension_semantics<parallel>], iteration_bounds = array<i64: 1>, scalar_prefetch = 0 : i64, scratch_operands = 0 : i64, tpu.core_type = #tpu.core_type<tc>, window_params = [{transform_indices = @transform_0, window_bounds = array<i64: 128, 256>}, {transform_indices = @transform_1, window_bounds = array<i64: 128, 256>}, {transform_indices = @transform_2, window_bounds = array<i64: 128, 256>}, {transform_indices = @transform_3, window_bounds = array<i64: 1, 128>}, {transform_indices = @transform_4, window_bounds = array<i64: 1, 128>}, {transform_indices = @transform_5, window_bounds = array<i64: 1, 128>}]} {
    %c0 = arith.constant 0 : index
    %c0_0 = arith.constant 0 : index
    %0 = vector.load %arg1[%c0, %c0_0] : memref<128x256xf32, #tpu.memory_space<vmem>>, vector<128x256xf32>
    %c0_1 = arith.constant 0 : index
    %c0_2 = arith.constant 0 : index
    %1 = vector.load %arg2[%c0_1, %c0_2] : memref<128x256xf32, #tpu.memory_space<vmem>>, vector<128x256xf32>
    %c0_3 = arith.constant 0 : index
    %c0_4 = arith.constant 0 : index
    %2 = vector.load %arg3[%c0_3, %c0_4] : memref<128x256xf32, #tpu.memory_space<vmem>>, vector<128x256xf32>
    %3 = arith.subf %0, %1 : vector<128x256xf32>
    %cst = arith.constant 9.99999997E-7 : f32
    %4 = vector.broadcast %cst : f32 to vector<128x256xf32>
    %5 = arith.addf %3, %4 : vector<128x256xf32>
    %6 = arith.mulf %5, %5 : vector<128x256xf32>
    %cst_5 = arith.constant dense<0.000000e+00> : vector<128xf32>
    %7 = vector.multi_reduction <add>, %6, %cst_5 [1] : vector<128x256xf32> to vector<128xf32>
    %8 = math.sqrt %7 : vector<128xf32>
    %9 = vector.shape_cast %8 : vector<128xf32> to vector<1x128xf32>
    %10 = arith.subf %0, %2 : vector<128x256xf32>
    %cst_6 = arith.constant 9.99999997E-7 : f32
    %11 = vector.broadcast %cst_6 : f32 to vector<128x256xf32>
    %12 = arith.addf %10, %11 : vector<128x256xf32>
    %13 = arith.mulf %12, %12 : vector<128x256xf32>
    %cst_7 = arith.constant dense<0.000000e+00> : vector<128xf32>
    %14 = vector.multi_reduction <add>, %13, %cst_7 [1] : vector<128x256xf32> to vector<128xf32>
    %15 = math.sqrt %14 : vector<128xf32>
    %16 = vector.shape_cast %15 : vector<128xf32> to vector<1x128xf32>
    %c0_8 = arith.constant 0 : index
    %c0_9 = arith.constant 0 : index
    %17 = vector.load %arg4[%c0_8, %c0_9] : memref<1x128xf32, #tpu.memory_space<vmem>>, vector<1x128xf32>
    %c0_10 = arith.constant 0 : index
    %c0_11 = arith.constant 0 : index
    %18 = vector.load %arg5[%c0_10, %c0_11] : memref<1x128xf32, #tpu.memory_space<vmem>>, vector<1x128xf32>
    %19 = arith.mulf %9, %17 : vector<1x128xf32>
    %cst_12 = arith.constant 1.000000e+00 : f32
    %20 = vector.broadcast %cst_12 : f32 to vector<1x128xf32>
    %21 = arith.subf %20, %18 : vector<1x128xf32>
    %22 = arith.mulf %16, %21 : vector<1x128xf32>
    %23 = arith.subf %17, %18 : vector<1x128xf32>
    %24 = math.absf %23 : vector<1x128xf32>
    %cst_13 = arith.constant 1.000000e+00 : f32
    %25 = vector.broadcast %cst_13 : f32 to vector<1x128xf32>
    %26 = arith.subf %25, %24 : vector<1x128xf32>
    %cst_14 = arith.constant 1.000000e-01 : f32
    %27 = vector.broadcast %cst_14 : f32 to vector<1x128xf32>
    %28 = arith.mulf %27, %26 : vector<1x128xf32>
    %cst_15 = arith.constant 3.000000e-01 : f32
    %29 = vector.broadcast %cst_15 : f32 to vector<1x128xf32>
    %30 = arith.addf %29, %28 : vector<1x128xf32>
    %31 = arith.subf %19, %22 : vector<1x128xf32>
    %32 = arith.addf %31, %30 : vector<1x128xf32>
    %cst_16 = arith.constant 0.000000e+00 : f32
    %33 = vector.broadcast %cst_16 : f32 to vector<1x128xf32>
    %34 = arith.maximumf %32, %33 : vector<1x128xf32>
    %c0_17 = arith.constant 0 : index
    %c0_18 = arith.constant 0 : index
    %35 = vector.load %arg6[%c0_17, %c0_18] : memref<1x128xf32, #tpu.memory_space<vmem>>, vector<1x128xf32>
    tpu.vector_store %arg6[%c0_17, %c0_18], %34 {strides = array<i32>} : memref<1x128xf32, #tpu.memory_space<vmem>>, vector<1x128xf32>,
    return
  }
  func.func @transform_0(%arg0: i32) -> (i32, i32) {
    %c0_i32 = arith.constant 0 : i32
    %c0_i32_0 = arith.constant 0 : i32
    return %arg0, %c0_i32 : i32, i32
  }
  func.func @transform_1(%arg0: i32) -> (i32, i32) {
    %c0_i32 = arith.constant 0 : i32
    %c0_i32_0 = arith.constant 0 : i32
    return %arg0, %c0_i32 : i32, i32
  }
  func.func @transform_2(%arg0: i32) -> (i32, i32) {
    %c0_i32 = arith.constant 0 : i32
    %c0_i32_0 = arith.constant 0 : i32
    return %arg0, %c0_i32 : i32, i32
  }
  func.func @transform_3(%arg0: i32) -> (i32, i32) {
    %c0_i32 = arith.constant 0 : i32
    %c0_i32_0 = arith.constant 0 : i32
    return %c0_i32, %arg0 : i32, i32
  }
  func.func @transform_4(%arg0: i32) -> (i32, i32) {
    %c0_i32 = arith.constant 0 : i32
    %c0_i32_0 = arith.constant 0 : i32
    return %c0_i32, %arg0 : i32, i32
  }
  func.func @transform_5(%arg0: i32) -> (i32, i32) {
    %c0_i32 = arith.constant 0 : i32
    %c0_i32_0 = arith.constant 0 : i32
    return %c0_i32, %arg0 : i32, i32
  }
}

</mosaic_0001>

<bundles_post_ra>
// kernel: tpu_custom_call.1
= control target key start
LH: loop header
LB: loop body
LE: loop exit
PB: predicated region body
PF: predicated region fallthrough
CT: control target
= control target key end

     0   :  { %10 = vsyncpa [#allocation3], 0  ;;  %s2413_s0 = inlined_call_operand.hbm [shape: f32[128,256], index: 0, kind: input, shape index: {}]   ;;  %s2414_s1 = inlined_call_operand.hbm [shape: f32[128,256], index: 1, kind: input, shape index: {}]   ;;  %s2415_s2 = inlined_call_operand.hbm [shape: f32[128,256], index: 2, kind: input, shape index: {}]   ;;  %s2416_s3 = inlined_call_operand.vmem [shape: f32[1,128], index: 3, kind: input, shape index: {}]   ;;  %s2417_s4 = inlined_call_operand.vmem [shape: f32[1,128], index: 4, kind: input, shape index: {}]   ;;  %s2418_s5 = inlined_call_operand.hbm [shape: f32[1,128], index: 5, kind: output, shape index: {}]  }
   0x1   :  { %11 = vsyncpa [#allocation6], 0 }
   0x2   :  { %12 = vsyncpa [#allocation4], 0  ;;  %s30_s20 = sshll.u32 %s2414_s1, 4  ;;  %s1637_s21 = smov [#allocation5]   ;;  %s31_s20 = int_to_ptr.hbm [resolvable:$true] %s30_s20 }
   0x3   :  { %s32_s22 = sshll.u32 %s1637_s21, 4  ;;  %s17_s25 = sshll.u32 %s2413_s0, 4  ;;  %s33_s22 = int_to_ptr.vmem [resolvable:$true] %s32_s22  ;;  %s18_s25 = int_to_ptr.hbm [resolvable:$true] %s17_s25 }
   0x4   :  { %s1638_s26 = smov 256   ;;  %s1639_s27 = smov 16  }
   0x5   :  { %38 = dma.hbm_to_vmem [thread:$0]  %s31_s20, 4096, %s33_s22, [#allocation6], %s1638_s26, %s1638_s26, %s1639_s27  }
   0x6   :  { %s1640_s28 = smov [#allocation2]   ;;  %s43_s7 = sshll.u32 %s2415_s2, 4  ;;  %s44_s7 = int_to_ptr.hbm [resolvable:$true] %s43_s7 }
   0x7   :  { %s19_s29 = sshll.u32 %s1640_s28, 4  ;;  %s1641_s1 = smov [#allocation7]   ;;  %s20_s29 = int_to_ptr.vmem [resolvable:$true] %s19_s29 }
   0x8   :  { %25 = dma.hbm_to_vmem [thread:$0]  %s18_s25, 4096, %s20_s29, [#allocation3], %s1638_s26, %s1638_s26, %s1639_s27  }
   0x9   :  { %s45_s8 = sshll.u32 %s1641_s1, 4  ;;  %s46_s8 = int_to_ptr.vmem [resolvable:$true] %s45_s8 }
   0xa   :  { %51 = dma.hbm_to_vmem [thread:$0]  %s44_s7, 4096, %s46_s8, [#allocation6], %s1638_s26, %s1638_s26, %s1639_s27  }
   0xb   :  { %1631 = dma.done.wait [#allocation3], 4096  }
   0xc   :  { %1632 = vsyncadd [#allocation3], 4294963200 }
   0xd   :  { %1633 = dma.done.wait [#allocation6], 8192  }
   0xe   :  { %1634 = vsyncadd [#allocation6], 4294959104  ;;  %v1683_v0 = vld [vmem:[#allocation2 + $0x40] sm:$0xff]  ;;  %v1685_v1 = vld [vmem:[#allocation2 + $0x48] sm:$0xff]  ;;  %s1402_s15 = sshll.u32 %s2418_s5, 4  ;;  %s1403_s15 = int_to_ptr.hbm [resolvable:$true] %s1402_s15 }
   0xf   :  { %v108_v2 = vld [vmem:[#allocation5 + $0x40] sm:$0xff]  ;;  %v109_v3 = vld [vmem:[#allocation5 + $0x48] sm:$0xff]  ;;  %v1701_v20 = vld [vmem:[#allocation2 + $0x50] sm:$0xff] }
  0x10   :  { %v172_v4 = vsub.f32 %v1683_v0, %v108_v2  ;;  %v1688_v5 = vld [vmem:[#allocation2 + $0x20] sm:$0xff]  ;;  %v1690_v6 = vld [vmem:[#allocation2 + $0x28] sm:$0xff]  ;;  %v173_v7 = vsub.f32 %v1685_v1, %v109_v3  ;;  %v1703_v21 = vld [vmem:[#allocation2 + $0x58] sm:$0xff] }
  0x11   :  { %v104_v8 = vld [vmem:[#allocation5 + $0x20] sm:$0xff]  ;;  %v105_v9 = vld [vmem:[#allocation5 + $0x28] sm:$0xff]  ;;  %v110_v22 = vld [vmem:[#allocation5 + $0x50] sm:$0xff] }
  0x12   :  { %v1693_v10 = vld [vmem:[#allocation2] sm:$0xff]  ;;  %v204_v11 = vadd.f32 1e-06, %v172_v4  ;;  %v168_v12 = vsub.f32 %v1688_v5, %v104_v8  ;;  %v169_v13 = vsub.f32 %v1690_v6, %v105_v9  ;;  %v1697_v14 = vld [vmem:[#allocation2 + $0x8] sm:$0xff]  ;;  %v205_v17 = vadd.f32 1e-06, %v173_v7 }
  0x13   :  { %v100_v15 = vld [vmem:[#allocation5] sm:$0xff]  ;;  %v101_v16 = vld [vmem:[#allocation5 + $0x8] sm:$0xff]  ;;  %v111_v26 = vld [vmem:[#allocation5 + $0x58] sm:$0xff]  ;;  %v174_v27 = vsub.f32 %v1701_v20, %v110_v22 }
  0x14   :  { %v164_v18 = vsub.f32 %v1693_v10, %v100_v15  ;;  %v165_v19 = vsub.f32 %v1697_v14, %v101_v16  ;;  %v236_v23 = vmul.f32 %v204_v11, %v204_v11  ;;  %v200_v24 = vadd.f32 1e-06, %v168_v12  ;;  %v1706_v28 = vld [vmem:[#allocation2 + $0x30] sm:$0xff]  ;;  %v1709_v33 = vld [vmem:[#allocation2 + $0x38] sm:$0xff]  ;;  %v1716_v48 = vld [vmem:[#allocation2 + $0x80] sm:$0xff] }
  0x15   :  { %v201_v25 = vadd.f32 1e-06, %v169_v13  ;;  %v237_v29 = vmul.f32 %v205_v17, %v205_v17  ;;  %v175_v32 = vsub.f32 %v1703_v21, %v111_v26  ;;  %v106_v34 = vld [vmem:[#allocation5 + $0x30] sm:$0xff]  ;;  %v206_v37 = vadd.f32 1e-06, %v174_v27  ;;  %v107_v38 = vld [vmem:[#allocation5 + $0x38] sm:$0xff] }
  0x16   :  { %v196_v30 = vadd.f32 1e-06, %v164_v18  ;;  %v197_v31 = vadd.f32 1e-06, %v165_v19  ;;  %v232_v35 = vmul.f32 %v200_v24, %v200_v24  ;;  %v170_v39 = vsub.f32 %v1706_v28, %v106_v34  ;;  %v1712_v40 = vld [vmem:[#allocation2 + $0x10] sm:$0xff]  ;;  %v1714_v41 = vld [vmem:[#allocation2 + $0x18] sm:$0xff] }
  0x17   :  { %v233_v36 = vmul.f32 %v201_v25, %v201_v25  ;;  %v272_v42 = vadd.f32 %v237_v29, %v236_v23  ;;  %v207_v45 = vadd.f32 1e-06, %v175_v32  ;;  %v102_v46 = vld [vmem:[#allocation5 + $0x10] sm:$0xff]  ;;  %v103_v47 = vld [vmem:[#allocation5 + $0x18] sm:$0xff]  ;;  %v238_v50 = vmul.f32 %v206_v37, %v206_v37  ;;  %v1719_v53 = vld [vmem:[#allocation2 + $0x88] sm:$0xff] }
  0x18   :  { %v228_v43 = vmul.f32 %v196_v30, %v196_v30  ;;  %v229_v44 = vmul.f32 %v197_v31, %v197_v31  ;;  %v171_v51 = vsub.f32 %v1709_v33, %v107_v38  ;;  %v202_v52 = vadd.f32 1e-06, %v170_v39  ;;  %v116_v54 = vld [vmem:[#allocation5 + $0x80] sm:$0xff]  ;;  %v117_v55 = vld [vmem:[#allocation5 + $0x88] sm:$0xff]  ;;  %v1723_v60 = vld [vmem:[#allocation2 + $0x70] sm:$0xff] }
  0x19   :  { %v266_v49 = vadd.f32 %v233_v36, %v232_v35  ;;  %273 = vadd.xlane.f32.xlu2 %v272_v42  ;;  %v239_v57 = vmul.f32 %v207_v45, %v207_v45  ;;  %v166_v58 = vsub.f32 %v1712_v40, %v102_v46  ;;  %v167_v59 = vsub.f32 %v1714_v41, %v103_v47  ;;  %v1725_v61 = vld [vmem:[#allocation2 + $0x78] sm:$0xff]  ;;  %v114_v62 = vld [vmem:[#allocation5 + $0x70] sm:$0xff]  ;;  %v1729_v8 = vld [vmem:[#allocation2 + $0x60] sm:$0xff] }
  0x1a   :  { %v260_v56 = vadd.f32 %v229_v44, %v228_v43  ;;  %v203_v63 = vadd.f32 1e-06, %v171_v51  ;;  %v234_v2 = vmul.f32 %v202_v52, %v202_v52  ;;  %v180_v3 = vsub.f32 %v1716_v48, %v116_v54  ;;  %v115_v7 = vld [vmem:[#allocation5 + $0x78] sm:$0xff]  ;;  %v112_v15 = vld [vmem:[#allocation5 + $0x60] sm:$0xff]  ;;  %v1733_v22 = vld [vmem:[#allocation2 + $0x68] sm:$0xff] }
  0x1b   :  { %267 = vadd.xlane.f32.xlu1 %v266_v49  ;;  %v181_v4 = vsub.f32 %v1719_v53, %v117_v55  ;;  %v275_v9 = vadd.f32 %v239_v57, %v238_v50  ;;  %v198_v11 = vadd.f32 1e-06, %v166_v58  ;;  %v199_v12 = vadd.f32 1e-06, %v167_v59  ;;  %v113_v23 = vld [vmem:[#allocation5 + $0x68] sm:$0xff]  ;;  %v1736_v29 = vld [vmem:[#allocation2 + $0xb0] sm:$0xff] }
  0x1c   :  { %261 = vadd.xlane.f32.xlu0 %v260_v56  ;;  %v178_v13 = vsub.f32 %v1723_v60, %v114_v62  ;;  %v235_v16 = vmul.f32 %v203_v63, %v203_v63  ;;  %v212_v17 = vadd.f32 1e-06, %v180_v3  ;;  %v179_v19 = vsub.f32 %v1725_v61, %v115_v7  ;;  %v1738_v30 = vld [vmem:[#allocation2 + $0xb8] sm:$0xff]  ;;  %v122_v31 = vld [vmem:[#allocation5 + $0xb0] sm:$0xff]  ;;  %v1740_v36 = vld [vmem:[#allocation2 + $0xa0] sm:$0xff] }
  0x1d   :  { %v213_v18 = vadd.f32 1e-06, %v181_v4  ;;  %v230_v24 = vmul.f32 %v198_v11, %v198_v11  ;;  %v231_v25 = vmul.f32 %v199_v12, %v199_v12  ;;  %v176_v27 = vsub.f32 %v1729_v8, %v112_v15  ;;  %v123_v35 = vld [vmem:[#allocation5 + $0xb8] sm:$0xff]  ;;  %v1742_v37 = vld [vmem:[#allocation2 + $0xa8] sm:$0xff]  ;;  %v120_v43 = vld [vmem:[#allocation5 + $0xa0] sm:$0xff] }
  0x1e   :  { %v210_v26 = vadd.f32 1e-06, %v178_v13  ;;  %v269_v32 = vadd.f32 %v235_v16, %v234_v2  ;;  %v211_v34 = vadd.f32 1e-06, %v179_v19  ;;  %v177_v39 = vsub.f32 %v1733_v22, %v113_v23  ;;  %v121_v44 = vld [vmem:[#allocation5 + $0xa8] sm:$0xff]  ;;  %v1745_v45 = vld [vmem:[#allocation2 + $0x90] sm:$0xff] }
  0x1f   :  { %v263_v38 = vadd.f32 %v231_v25, %v230_v24  ;;  %v208_v42 = vadd.f32 1e-06, %v176_v27  ;;  %v244_v46 = vmul.f32 %v212_v17, %v212_v17  ;;  %v1747_v47 = vld [vmem:[#allocation2 + $0x98] sm:$0xff]  ;;  %v118_v49 = vld [vmem:[#allocation5 + $0x90] sm:$0xff]  ;;  %v245_v51 = vmul.f32 %v213_v18, %v213_v18  ;;  %v1755_v4 = vld [vmem:[#allocation2 + $0xe0] sm:$0xff] }
  0x20   :  { %v119_v50 = vld [vmem:[#allocation5 + $0x98] sm:$0xff]  ;;  %v209_v52 = vadd.f32 1e-06, %v177_v39  ;;  %v186_v54 = vsub.f32 %v1736_v29, %v122_v31  ;;  %v187_v55 = vsub.f32 %v1738_v30, %v123_v35  ;;  %v242_v56 = vmul.f32 %v210_v26, %v210_v26  ;;  %v1757_v7 = vld [vmem:[#allocation2 + $0xe8] sm:$0xff]  ;;  %v1759_v16 = vld [vmem:[#allocation2 + $0xd0] sm:$0xff] }
  0x21   :  { %276 = vadd.xlane.f32.xlu2 %v275_v9  ;;  %v243_v57 = vmul.f32 %v211_v34, %v211_v34  ;;  %v184_v58 = vsub.f32 %v1740_v36, %v120_v43  ;;  %v185_v59 = vsub.f32 %v1742_v37, %v121_v44  ;;  %v240_v62 = vmul.f32 %v208_v42, %v208_v42  ;;  %v128_v9 = vld [vmem:[#allocation5 + $0xe0] sm:$0xff]  ;;  %v129_v15 = vld [vmem:[#allocation5 + $0xe8] sm:$0xff]  ;;  %v1761_v23 = vld [vmem:[#allocation2 + $0xd8] sm:$0xff] }
  0x22   :  { %v241_v63 = vmul.f32 %v209_v52, %v209_v52  ;;  %v182_v2 = vsub.f32 %v1745_v45, %v118_v49  ;;  %v183_v3 = vsub.f32 %v1747_v47, %v119_v50  ;;  %v284_v11 = vadd.f32 %v245_v51, %v244_v46  ;;  %v126_v24 = vld [vmem:[#allocation5 + $0xd0] sm:$0xff]  ;;  %v127_v31 = vld [vmem:[#allocation5 + $0xd8] sm:$0xff]  ;;  %v1765_v34 = vld [vmem:[#allocation2 + $0xc8] sm:$0xff] }
  0x23   :  { %270 = vadd.xlane.f32.xlu1 %v269_v32  ;;  %v218_v12 = vadd.f32 1e-06, %v186_v54  ;;  %v219_v13 = vadd.f32 1e-06, %v187_v55  ;;  %v281_v17 = vadd.f32 %v243_v57, %v242_v56  ;;  %v216_v18 = vadd.f32 1e-06, %v184_v58 }
  0x24   :  { %264 = vadd.xlane.f32.xlu0 %v263_v38  ;;  %v217_v19 = vadd.f32 1e-06, %v185_v59  ;;  %v278_v25 = vadd.f32 %v241_v63, %v240_v62  ;;  %v214_v26 = vadd.f32 1e-06, %v182_v2  ;;  %v215_v27 = vadd.f32 1e-06, %v183_v3 }
  0x25   :  { %v1763_v32 = vld [vmem:[#allocation2 + $0xc0] sm:$0xff]  ;;  %v125_v38 = vld [vmem:[#allocation5 + $0xc8] sm:$0xff]  ;;  %v250_v39 = vmul.f32 %v218_v12, %v218_v12  ;;  %v251_v42 = vmul.f32 %v219_v13, %v219_v13  ;;  %v192_v43 = vsub.f32 %v1755_v4, %v128_v9  ;;  %v193_v44 = vsub.f32 %v1757_v7, %v129_v15  ;;  %v134_v62 = vld [vmem:[#allocation7 + $0x10] sm:$0xff] }
  0x26   :  { %v124_v35 = vld [vmem:[#allocation5 + $0xc0] sm:$0xff]  ;;  %v248_v46 = vmul.f32 %v216_v18, %v216_v18  ;;  %v249_v49 = vmul.f32 %v217_v19, %v217_v19  ;;  %v190_v50 = vsub.f32 %v1759_v16, %v126_v24  ;;  %v191_v51 = vsub.f32 %v1761_v23, %v127_v31  ;;  %v135_v9 = vld [vmem:[#allocation7 + $0x18] sm:$0xff]  ;;  %v1773_v18 = vld [vmem:[#allocation2 + $0xf0] sm:$0xff] }
  0x27   :  { %v246_v52 = vmul.f32 %v214_v26, %v214_v26  ;;  %v247_v54 = vmul.f32 %v215_v27, %v215_v27  ;;  %v188_v55 = vsub.f32 %v1763_v32, %v124_v35  ;;  %v189_v56 = vsub.f32 %v1765_v34, %v125_v38  ;;  %v1775_v19 = vld [vmem:[#allocation2 + $0xf8] sm:$0xff]  ;;  %v130_v24 = vld [vmem:[#allocation5 + $0xf0] sm:$0xff] }
  0x28   :  { %v293_v57 = vadd.f32 %v251_v42, %v250_v39  ;;  %v224_v58 = vadd.f32 1e-06, %v192_v43  ;;  %v225_v59 = vadd.f32 1e-06, %v193_v44  ;;  %v290_v63 = vadd.f32 %v249_v49, %v248_v46 }
  0x29   :  { %285 = vadd.xlane.f32.xlu2 %v284_v11  ;;  %v222_v2 = vadd.f32 1e-06, %v190_v50  ;;  %v223_v3 = vadd.f32 1e-06, %v191_v51  ;;  %v132_v11 = vld [vmem:[#allocation7] sm:$0xff]  ;;  %v287_v12 = vadd.f32 %v247_v54, %v246_v52  ;;  %v502_v31 = vsub.f32 %v1712_v40, %v134_v62  ;;  %v138_v62 = vld [vmem:[#allocation7 + $0x30] sm:$0xff] }
  0x2a   :  { %v220_v13 = vadd.f32 1e-06, %v188_v55  ;;  %v221_v15 = vadd.f32 1e-06, %v189_v56  ;;  %v256_v26 = vmul.f32 %v224_v58, %v224_v58  ;;  %v257_v27 = vmul.f32 %v225_v59, %v225_v59  ;;  %v140_v40 = vld [vmem:[#allocation7 + $0x40] sm:$0xff] }
  0x2b   :  { %282 = vadd.xlane.f32.xlu1 %v281_v17  ;;  %v133_v17 = vld [vmem:[#allocation7 + $0x8] sm:$0xff]  ;;  %v503_v35 = vsub.f32 %v1714_v41, %v135_v9  ;;  %v254_v38 = vmul.f32 %v222_v2, %v222_v2  ;;  %v255_v39 = vmul.f32 %v223_v3, %v223_v3  ;;  %v500_v42 = vsub.f32 %v1693_v10, %v132_v11  ;;  %v136_v2 = vld [vmem:[#allocation7 + $0x20] sm:$0xff] }
  0x2c   :  { %279 = vadd.xlane.f32.xlu0 %v278_v25  ;;  %v131_v25 = vld [vmem:[#allocation5 + $0xf8] sm:$0xff]  ;;  %v501_v43 = vsub.f32 %v1697_v14, %v133_v17  ;;  %v252_v44 = vmul.f32 %v220_v13, %v220_v13  ;;  %v253_v46 = vmul.f32 %v221_v15, %v221_v15  ;;  %v194_v49 = vsub.f32 %v1773_v18, %v130_v24  ;;  %v137_v3 = vld [vmem:[#allocation7 + $0x28] sm:$0xff] }
  0x2d   :  { %v195_v50 = vsub.f32 %v1775_v19, %v131_v25  ;;  %v302_v51 = vadd.f32 %v257_v27, %v256_v26  ;;  %v534_v52 = vadd.f32 1e-06, %v502_v31  ;;  %v535_v54 = vadd.f32 1e-06, %v503_v35  ;;  %v139_v14 = vld [vmem:[#allocation7 + $0x38] sm:$0xff] }
  0x2e   :  { %v299_v55 = vadd.f32 %v255_v39, %v254_v38  ;;  %v532_v41 = vadd.f32 1e-06, %v500_v42  ;;  %v533_v56 = vadd.f32 1e-06, %v501_v43  ;;  %v296_v58 = vadd.f32 %v253_v46, %v252_v44  ;;  %v146_v39 = vld [vmem:[#allocation7 + $0x70] sm:$0xff]  ;;  %v147_v44 = vld [vmem:[#allocation7 + $0x78] sm:$0xff] }
  0x2f   :  { %v226_v59 = vadd.f32 1e-06, %v194_v49  ;;  %v227_v10 = vadd.f32 1e-06, %v195_v50  ;;  %v566_v9 = vmul.f32 %v534_v52, %v534_v52  ;;  %v567_v11 = vmul.f32 %v535_v54, %v535_v54  ;;  %v144_v46 = vld [vmem:[#allocation7 + $0x60] sm:$0xff]  ;;  %v143_v54 = vld [vmem:[#allocation7 + $0x58] sm:$0xff] }
  0x30   :  { %v564_v13 = vmul.f32 %v532_v41, %v532_v41  ;;  %v565_v15 = vmul.f32 %v533_v56, %v533_v56  ;;  %v506_v17 = vsub.f32 %v1706_v28, %v138_v62  ;;  %v507_v24 = vsub.f32 %v1709_v33, %v139_v14  ;;  %v145_v33 = vld [vmem:[#allocation7 + $0x68] sm:$0xff]  ;;  %v152_v14 = vld [vmem:[#allocation7 + $0xa0] sm:$0xff] }
  0x31   :  { %294 = vadd.xlane.f32.xlu2 %v293_v57  ;;  %v141_v57 = vld [vmem:[#allocation7 + $0x48] sm:$0xff]  ;;  %v258_v25 = vmul.f32 %v226_v59, %v226_v59  ;;  %v259_v26 = vmul.f32 %v227_v10, %v227_v10  ;;  %v504_v27 = vsub.f32 %v1688_v5, %v136_v2  ;;  %v599_v35 = vadd.f32 %v567_v11, %v566_v9 }
  0x32   :  { %v596_v42 = vadd.f32 %v565_v15, %v564_v13  ;;  %v539_v43 = vadd.f32 1e-06, %v507_v24  ;;  %v511_v62 = vsub.f32 %v1703_v21, %v143_v54  ;;  %v153_v11 = vld [vmem:[#allocation7 + $0xa8] sm:$0xff]  ;;  %v150_v15 = vld [vmem:[#allocation7 + $0x90] sm:$0xff] }
  0x33   :  { %291 = vadd.xlane.f32.xlu1 %v290_v63  ;;  %v508_v63 = vsub.f32 %v1683_v0, %v140_v40  ;;  %v505_v0 = vsub.f32 %v1690_v6, %v137_v3  ;;  %v305_v49 = vadd.f32 %v259_v26, %v258_v25  ;;  %v536_v28 = vadd.f32 1e-06, %v504_v27  ;;  %v149_v24 = vld [vmem:[#allocation7 + $0x88] sm:$0xff] }
  0x34   :  { %288 = vadd.xlane.f32.xlu0 %v287_v12  ;;  %v509_v12 = vsub.f32 %v1685_v1, %v141_v57  ;;  %v538_v1 = vadd.f32 1e-06, %v506_v17  ;;  %v514_v6 = vsub.f32 %v1723_v60, %v146_v39  ;;  %v515_v40 = vsub.f32 %v1725_v61, %v147_v44  ;;  %v148_v17 = vld [vmem:[#allocation7 + $0x80] sm:$0xff] }
  0x35   :  { %v540_v31 = vadd.f32 1e-06, %v508_v63  ;;  %v537_v50 = vadd.f32 1e-06, %v505_v0  ;;  %v571_v56 = vmul.f32 %v539_v43, %v539_v43  ;;  %v513_v57 = vsub.f32 %v1733_v22, %v145_v33  ;;  %v151_v22 = vld [vmem:[#allocation7 + $0x98] sm:$0xff] }
  0x36   :  { %v541_v38 = vadd.f32 1e-06, %v509_v12  ;;  %v570_v41 = vmul.f32 %v538_v1, %v538_v1  ;;  %v568_v59 = vmul.f32 %v536_v28, %v536_v28  ;;  %v546_v2 = vadd.f32 1e-06, %v514_v6 }
  0x37   :  { %v572_v52 = vmul.f32 %v540_v31, %v540_v31  ;;  %v569_v10 = vmul.f32 %v537_v50, %v537_v50  ;;  %v547_v60 = vadd.f32 1e-06, %v515_v40  ;;  %v545_v9 = vadd.f32 1e-06, %v513_v57  ;;  %v154_v40 = vld [vmem:[#allocation7 + $0xb0] sm:$0xff] }
  0x38   :  { %v573_v5 = vmul.f32 %v541_v38, %v541_v38  ;;  %v605_v61 = vadd.f32 %v571_v56, %v570_v41  ;;  %v543_v13 = vadd.f32 1e-06, %v511_v62  ;;  %v578_v25 = vmul.f32 %v546_v2, %v546_v2 }
  0x39   :  { %303 = vadd.xlane.f32.xlu2 %v302_v51  ;;  %v142_v51 = vld [vmem:[#allocation7 + $0x50] sm:$0xff]  ;;  %v602_v12 = vadd.f32 %v569_v10, %v568_v59  ;;  %v579_v21 = vmul.f32 %v547_v60, %v547_v60  ;;  %v521_v27 = vsub.f32 %v1742_v37, %v153_v11  ;;  %v577_v0 = vmul.f32 %v545_v9, %v545_v9 }
  0x3a   :  { %v608_v63 = vadd.f32 %v573_v5, %v572_v52  ;;  %v519_v38 = vsub.f32 %v1747_v47, %v151_v22  ;;  %v575_v39 = vmul.f32 %v543_v13, %v543_v13  ;;  %v2419_v1 = vlaneseq  ;;  %v157_v5 = vld [vmem:[#allocation7 + $0xc8] sm:$0xff]  ;;  %v162_v9 = vld [vmem:[#allocation7 + $0xf0] sm:$0xff]  ;;  %v163_v13 = vld [vmem:[#allocation7 + $0xf8] sm:$0xff] }
  0x3b   :  { %300 = vadd.xlane.f32.xlu1 %v299_v55  ;;  %v512_v55 = vsub.f32 %v1729_v8, %v144_v46  ;;  %v617_v44 = vadd.f32 %v579_v21, %v578_v25  ;;  %v553_v46 = vadd.f32 1e-06, %v521_v27  ;;  %v525_v10 = vsub.f32 %v1765_v34, %v157_v5  ;;  %v161_v34 = vld [vmem:[#allocation7 + $0xe8] sm:$0xff]  ;;  %v837_v5 = vld [vmem:[%s2417_s4] sm:$0x1] }
  0x3c   :  { %297 = vadd.xlane.f32.xlu0 %v296_v58  ;;  %v510_v58 = vsub.f32 %v1701_v20, %v142_v51  ;;  %v520_v20 = vsub.f32 %v1740_v36, %v152_v14  ;;  %v517_v36 = vsub.f32 %v1719_v53, %v149_v24  ;;  %v1802_v37 = vshrl.u32 %v2419_v1, 7  ;;  %v156_v51 = vld [vmem:[#allocation7 + $0xc0] sm:$0xff] }
  0x3d   :  { %v544_v3 = vadd.f32 1e-06, %v512_v55  ;;  %v551_v33 = vadd.f32 1e-06, %v519_v38  ;;  %v155_v55 = vld [vmem:[#allocation7 + $0xb8] sm:$0xff]  ;;  %v585_v41 = vmul.f32 %v553_v46, %v553_v46  ;;  %v524_v57 = vsub.f32 %v1763_v32, %v156_v51 }
  0x3e   :  { %v542_v8 = vadd.f32 1e-06, %v510_v58  ;;  %v552_v43 = vadd.f32 1e-06, %v520_v20  ;;  %v549_v54 = vadd.f32 1e-06, %v517_v36  ;;  %1420 = vset.pattern.permute.xlu2 %v1802_v37  ;;  %v530_v24 = vsub.f32 %v1773_v18, %v162_v9 }
  0x3f   :  { %v576_v26 = vmul.f32 %v544_v3, %v544_v3  ;;  %v583_v59 = vmul.f32 %v551_v33, %v551_v33  ;;  %v557_v32 = vadd.f32 1e-06, %v525_v10  ;;  %v531_v25 = vsub.f32 %v1775_v19, %v163_v13 }
  0x40   :  { %v574_v31 = vmul.f32 %v542_v8, %v542_v8  ;;  %v584_v53 = vmul.f32 %v552_v43, %v552_v43  ;;  %v581_v14 = vmul.f32 %v549_v54, %v549_v54  ;;  %v562_v38 = vadd.f32 1e-06, %v530_v24 }
  0x41   :  { %600 = vadd.xlane.f32.xlu2 %v599_v35  ;;  %v518_v35 = vsub.f32 %v1745_v45, %v150_v15  ;;  %v614_v28 = vadd.f32 %v577_v0, %v576_v26  ;;  %v159_v45 = vld [vmem:[#allocation7 + $0xd8] sm:$0xff]  ;;  %v160_v15 = vld [vmem:[#allocation7 + $0xe0] sm:$0xff]  ;;  %v529_v0 = vsub.f32 %v1757_v7, %v161_v34  ;;  %v1840_v33 = vadd.s32 40, %v1802_v37 }
  0x42   :  { %v611_v47 = vadd.f32 %v575_v39, %v574_v31  ;;  %v527_v56 = vsub.f32 %v1761_v23, %v159_v45  ;;  %v626_v2 = vadd.f32 %v585_v41, %v584_v53  ;;  %v556_v23 = vadd.f32 1e-06, %v524_v57  ;;  %v1826_v7 = vld [vmem:[%s2416_s3] ss:$0 sm:$0xff] }
  0x43   :  { %597 = vadd.xlane.f32.xlu1 %v596_v42  ;;  %v516_v42 = vsub.f32 %v1716_v48, %v148_v17  ;;  %v550_v50 = vadd.f32 1e-06, %v518_v35  ;;  %v1806_v48 = vadd.s32 64, %v1802_v37  ;;  %v528_v21 = vsub.f32 %v1755_v4, %v160_v15 }
  0x44   :  { %306 = vadd.xlane.f32.xlu0 %v305_v49  ;;  %v158_v49 = vld [vmem:[#allocation7 + $0xd0] sm:$0xff]  ;;  %v559_v3 = vadd.f32 1e-06, %v527_v56  ;;  %v588_v17 = vmul.f32 %v556_v23, %v556_v23  ;;  %v563_v39 = vadd.f32 1e-06, %v531_v25  ;;  %v594_v18 = vmul.f32 %v562_v38, %v562_v38 }
  0x45   :  { %v548_v52 = vadd.f32 1e-06, %v516_v42  ;;  %v526_v6 = vsub.f32 %v1759_v16, %v158_v49  ;;  %1427 = vset.pattern.permute.xlu0 %v1806_v48  ;;  %v582_v58 = vmul.f32 %v550_v50, %v550_v50  ;;  %v522_v16 = vsub.f32 %v1736_v29, %v154_v40 }
  0x46   :  { %v591_v20 = vmul.f32 %v559_v3, %v559_v3  ;;  %v1816_v29 = vadd.s32 16, %v1802_v37  ;;  %v560_v36 = vadd.f32 1e-06, %v528_v21  ;;  %v561_v43 = vadd.f32 1e-06, %v529_v0 }
  0x47   :  { %v580_v62 = vmul.f32 %v548_v52, %v548_v52  ;;  %v558_v60 = vadd.f32 1e-06, %v526_v6  ;;  %v554_v11 = vadd.f32 1e-06, %v522_v16  ;;  %v595_v19 = vmul.f32 %v563_v39, %v563_v39 }
  0x48   :  { %1421 = vset.pattern.permute.xlu1 %v1816_v29  ;;  %v592_v4 = vmul.f32 %v560_v36, %v560_v36  ;;  %v1836_v50 = vadd.s32 104, %v1802_v37  ;;  %v1867_v40 = vadd.s32 56, %v1802_v37  ;;  %v1893_v16 = vadd.s32 80, %v1802_v37 }
  0x49   :  { %609 = vadd.xlane.f32.xlu2 %v608_v63  ;;  %v523_v63 = vsub.f32 %v1738_v30, %v155_v55  ;;  %v620_v8 = vadd.f32 %v581_v14, %v580_v62  ;;  %v590_v22 = vmul.f32 %v558_v60, %v558_v60  ;;  %v589_v30 = vmul.f32 %v557_v32, %v557_v32 }
  0x4a   :  { %v586_v26 = vmul.f32 %v554_v11, %v554_v11  ;;  %v641_v46 = vadd.f32 %v595_v19, %v594_v18  ;;  %v968_v55 = vsub.f32 1.0, %v837_v5  ;;  %v1910_v23 = vadd.s32 96, %v1802_v37  ;;  %v836_v11 = vld [vmem:[%s2416_s3] sm:$0x1]  ;;  %s1643_s3 = smov [#allocation8]  }
  0x4b   :  { %606 = vadd.xlane.f32.xlu1 %v605_v61  ;;  %v623_v61 = vadd.f32 %v583_v59, %v582_v58  ;;  %v635_v31 = vadd.f32 %v591_v20, %v590_v22  ;;  %v632_v35 = vadd.f32 %v589_v30, %v588_v17  ;;  %v1878_v58 = vadd.s32 48, %v1802_v37  ;;  %s1400_s12 = sshll.u32 %s1643_s3, 4  ;;  %s1401_s12 = int_to_ptr.vmem [resolvable:$true] %s1400_s12 }
  0x4c   :  { %603 = vadd.xlane.f32.xlu0 %v602_v12  ;;  %v555_v12 = vadd.f32 1e-06, %v523_v63  ;;  %v1871_v41 = vperm.slane %v968_v55, 0  ;;  %2430 = vst [vmem:[#allocation14_spill] sm:$0xff] %v1910_v23  ;;  %v1928_v13 = vadd.s32 88, %v1802_v37  ;;  %v1099_v22 = vsub.f32 %v836_v11, %v837_v5 }
  0x4d   :  { %v848_v20 = vadd.s32 8, %v1802_v37  ;;  %v1954_v36 = vadd.s32 112, %v1802_v37 }
  0x4e   :  { %v587_v27 = vmul.f32 %v555_v12, %v555_v12  ;;  %v1100_v30 = vand.u32 2147483647, %v1099_v22 }
  0x50   :  { %v629_v42 = vadd.f32 %v587_v27, %v586_v26  ;;  %v1943_v26 = vadd.s32 120, %v1802_v37  ;;  %v1101_v0 = vsub.f32 1.0, %v1100_v30 }
  0x51   :  { %618 = vadd.xlane.f32.xlu2 %v617_v44  ;;  %v593_v44 = vmul.f32 %v561_v43, %v561_v43 }
  0x52   :  { %v1102_v39 = vmul.f32 0.1, %v1101_v0 }
  0x53   :  { %615 = vadd.xlane.f32.xlu1 %v614_v28  ;;  %v638_v49 = vadd.f32 %v593_v44, %v592_v4  ;;  %v1830_v28 = vadd.s32 24, %v1802_v37 }
  0x54   :  { %612 = vadd.xlane.f32.xlu0 %v611_v47  ;;  %v1849_v47 = vadd.s32 32, %v1802_v37  ;;  %v1103_v4 = vadd.f32 0.3, %v1102_v39 }
  0x56   :  { %v1966_v55 = vperm.slane %v1103_v4, 0 }
  0x59   :  { %627 = vadd.xlane.f32.xlu2 %v626_v2  ;;  %v1900_v2 = vadd.s32 72, %v1802_v37 }
  0x5b   :  { %624 = vadd.xlane.f32.xlu1 %v623_v61  ;;  %2429 = vst [vmem:[#allocation13_spill] sm:$0xff] %v1900_v2 }
  0x5c   :  { %621 = vadd.xlane.f32.xlu0 %v620_v8 }
  0x61   :  { %636 = vadd.xlane.f32.xlu2 %v635_v31 }
  0x63   :  { %633 = vadd.xlane.f32.xlu1 %v632_v35 }
  0x64   :  { %630 = vadd.xlane.f32.xlu0 %v629_v42 }
  0x6b   :  { %642 = vadd.xlane.f32.xlu1 %v641_v46 }
  0x6c   :  { %639 = vadd.xlane.f32.xlu0 %v638_v49 }
  0x79   :  { %844 = vperm.xlu2 %1420, %v1826_v7  }
  0x80   :  { %892 = vperm.xlu0 %1427, %v1826_v7  }
  0x81   :  { %1422 = vset.pattern.permute.xlu2 %v1830_v28 }
  0x84   :  { %856 = vperm.xlu1 %1421, %v1826_v7  }
  0x88   :  { %1432 = vset.pattern.permute.xlu0 %v1836_v50 }
  0x89   :  { %862 = vperm.xlu2 %1422, %v1826_v7  }
  0x8c   :  { %1424 = vset.pattern.permute.xlu1 %v1840_v33  ;;  %v1844_v45 = vpop.xlane.xlu2 %273 }
  0x8d   :  { %vm363_vm5 = vcmp.eq.f32.partialorder %v1844_v45, inf  ;;  %vm365_vm7 = vcmp.eq.f32.partialorder %v1844_v45, 0.0 }
  0x8e   :  { %v1846_v51 = vpop.xlane.xlu1 %267 }
  0x8f   :  { %v1851_v52 = vpop.xlane.xlu0 %261  ;;  %vm339_vm8 = vcmp.eq.f32.partialorder %v1846_v51, inf  ;;  %vm341_vm9 = vcmp.eq.f32.partialorder %v1846_v51, 0.0 }
  0x90   :  { %922 = vperm.xlu0 %1432, %v1826_v7   ;;  %1471 = vrsqrt.f32 %v1851_v52  ;;  %vm315_vm0 = vcmp.eq.f32.partialorder %v1851_v52, inf  ;;  %v318_v22 = vand.u32 2147483648, %v1851_v52  ;;  %vm317_vm1 = vcmp.eq.f32.partialorder %v1851_v52, 0.0 }
  0x91   :  { %1423 = vset.pattern.permute.xlu2 %v1849_v47 }
  0x94   :  { %874 = vperm.xlu1 %1424, %v1826_v7   ;;  %v1856_v54 = vpop.xlane.xlu2 %276 }
  0x95   :  { %vm375_vm12 = vcmp.eq.f32.partialorder %v1856_v54, inf  ;;  %vm377_vm13 = vcmp.eq.f32.partialorder %v1856_v54, 0.0 }
  0x96   :  { %v1861_v53 = vpop.xlane.xlu1 %270  ;;  %v1472_v8 = vpop.eup %1471 }
  0x97   :  { %v1863_v6 = vpop.xlane.xlu0 %264  ;;  %v309_v34 = vmul.f32 %v1472_v8, %v1851_v52  ;;  %1473 = vrsqrt.f32 %v1861_v53  ;;  %vm351_vm2 = vcmp.eq.f32.partialorder %v1861_v53, inf  ;;  %vm353_vm3 = vcmp.eq.f32.partialorder %v1861_v53, 0.0 }
  0x98   :  { %2428 = vst [vmem:[#allocation12_spill] sm:$0xff] %v1863_v6  ;;  %1437 = vset.pattern.permute.xlu0 %v1816_v29 }
  0x99   :  { %868 = vperm.xlu2 %1423, %v1826_v7   ;;  %v310_v17 = vmul.f32 %v1472_v8, %v309_v34 }
  0x9b   :  { %v311_v27 = vmul.f32 0.5, %v310_v17 }
  0x9c   :  { %1426 = vset.pattern.permute.xlu1 %v1867_v40  ;;  %v1873_v56 = vpop.xlane.xlu2 %285 }
  0x9d   :  { %v1474_v21 = vpop.eup %1473  ;;  %v312_v38 = vsub.f32 1.5, %v311_v27  ;;  %1475 = vrsqrt.f32 %v1873_v56  ;;  %vm411_vm4 = vcmp.eq.f32.partialorder %v1873_v56, inf  ;;  %vm413_vm6 = vcmp.eq.f32.partialorder %v1873_v56, 0.0 }
  0x9e   :  { %v1875_v57 = vpop.xlane.xlu1 %282  ;;  %v345_v35 = vmul.f32 %v1474_v21, %v1861_v53  ;;  %1477 = vrsqrt.f32 %v1844_v45 }
  0x9f   :  { %v1880_v59 = vpop.xlane.xlu0 %279  ;;  %v313_v19 = vmul.f32 %v1472_v8, %v312_v38  ;;  %1479 = vrsqrt.f32 %v1846_v51 }
  0xa0   :  { %987 = vperm.xlu0 %1437, %v1871_v41   ;;  %v346_v43 = vmul.f32 %v1474_v21, %v345_v35 }
  0xa1   :  { %1425 = vset.pattern.permute.xlu2 %v1878_v58  ;;  %v314_v5 = vmul.f32 %v313_v19, %v1851_v52 }
  0xa2   :  { %v347_v44 = vmul.f32 0.5, %v346_v43 }
  0xa3   :  { %v1476_v46 = vpop.eup %1475  ;;  %v316_v27 = vsel %vm315_vm0, %v1851_v52, %v314_v5  ;;  %vm399_vm0 = vcmp.eq.f32.partialorder %v1875_v57, inf }
  0xa4   :  { %886 = vperm.xlu1 %1426, %v1826_v7   ;;  %v1885_v10 = vpop.xlane.xlu2 %294  ;;  %v1478_v8 = vpop.eup %1477  ;;  %v348_v34 = vsub.f32 1.5, %v347_v44  ;;  %v405_v17 = vmul.f32 %v1476_v46, %v1873_v56  ;;  %v319_v39 = vsel %vm317_vm1, %v318_v22, %v316_v27  ;;  %vm401_vm1 = vcmp.eq.f32.partialorder %v1875_v57, 0.0 }
  0xa5   :  { %v1480_v30 = vpop.eup %1479  ;;  %v357_v0 = vmul.f32 %v1478_v8, %v1844_v45 }
  0xa6   :  { %v1889_v14 = vpop.xlane.xlu1 %291  ;;  %v349_v38 = vmul.f32 %v1474_v21, %v348_v34  ;;  %v406_v43 = vmul.f32 %v1476_v46, %v405_v17  ;;  %v333_v19 = vmul.f32 %v1480_v30, %v1846_v51  ;;  %v354_v21 = vand.u32 2147483648, %v1861_v53 }
  0xa7   :  { %v1887_v62 = vpop.xlane.xlu0 %288  ;;  %v358_v44 = vmul.f32 %v1478_v8, %v357_v0 }
  0xa8   :  { %1442 = vset.pattern.permute.xlu0 %v1867_v40  ;;  %v350_v1 = vmul.f32 %v349_v38, %v1861_v53  ;;  %v334_v6 = vmul.f32 %v1480_v30, %v333_v19 }
  0xa9   :  { %880 = vperm.xlu2 %1425, %v1826_v7  }
  0xaa   :  { %v335_v22 = vmul.f32 0.5, %v334_v6 }
  0xac   :  { %1429 = vset.pattern.permute.xlu1 %v1893_v16  ;;  %v1897_v63 = vpop.xlane.xlu2 %303 }
  0xae   :  { %v1905_v3 = vpop.xlane.xlu1 %300 }
  0xaf   :  { %v1902_v60 = vpop.xlane.xlu0 %297  ;;  %1481 = vrsqrt.f32 %v1905_v3  ;;  %vm471_vm10 = vcmp.eq.f32.partialorder %v1905_v3, inf  ;;  %vm473_vm11 = vcmp.eq.f32.partialorder %v1905_v3, 0.0 }
  0xb0   :  { %1017 = vperm.xlu0 %1442, %v1871_v41   ;;  %1483 = vrsqrt.f32 %v1856_v54 }
  0xb1   :  { %1428 = vset.pattern.permute.xlu2 %v1900_v2 }
  0xb4   :  { %904 = vperm.xlu1 %1429, %v1826_v7   ;;  %v1912_v61 = vpop.xlane.xlu2 %600 }
  0xb5   :  { %2431 = vst [vmem:[#allocation15_spill] sm:$0xff] %v1912_v61  ;;  %v1482_v17 = vpop.eup %1481 }
  0xb6   :  { %v1919_v9 = vpop.xlane.xlu1 %597 }
  0xb7   :  { %v1915_v32 = vpop.xlane.xlu0 %306 }
  0xb8   :  { %1447 = vset.pattern.permute.xlu0 %v1910_v23 }
  0xb9   :  { %898 = vperm.xlu2 %1428, %v1826_v7  }
  0xbc   :  { %1431 = vset.pattern.permute.xlu1 %v1910_v23  ;;  %v1925_v12 = vpop.xlane.xlu2 %609  ;;  %v407_v23 = vmul.f32 0.5, %v406_v43 }
  0xbe   :  { %v1940_v25 = vpop.xlane.xlu1 %606  ;;  %v408_v34 = vsub.f32 1.5, %v407_v23 }
  0xbf   :  { %v1931_v15 = vpop.xlane.xlu0 %603 }
  0xc0   :  { %1047 = vperm.xlu0 %1447, %v1871_v41   ;;  %v409_v19 = vmul.f32 %v1476_v46, %v408_v34  ;;  %1485 = vrsqrt.f32 %v1931_v15  ;;  %vm675_vm14 = vcmp.eq.f32.partialorder %v1931_v15, inf  ;;  %vm677_vm15 = vcmp.eq.f32.partialorder %v1931_v15, 0.0 }
  0xc1   :  { %1430 = vset.pattern.permute.xlu2 %v1928_v13  ;;  %1487 = vrsqrt.f32 %v1875_v57 }
  0xc2   :  { %v410_v23 = vmul.f32 %v409_v19, %v1873_v56 }
  0xc4   :  { %916 = vperm.xlu1 %1431, %v1826_v7   ;;  %v1938_v24 = vpop.xlane.xlu2 %618 }
  0xc5   :  { %1489 = vrsqrt.f32 %v1938_v24 }
  0xc6   :  { %v1957_v18 = vpop.xlane.xlu1 %615  ;;  %1491 = vrsqrt.f32 %v1885_v10 }
  0xc7   :  { %v1946_v31 = vpop.xlane.xlu0 %612  ;;  %1493 = vrsqrt.f32 %v1889_v14 }
  0xc8   :  { %1448 = vset.pattern.permute.xlu0 %v848_v20 }
  0xc9   :  { %910 = vperm.xlu2 %1430, %v1826_v7  }
  0xcc   :  { %1434 = vset.pattern.permute.xlu1 %v1943_v26  ;;  %v1950_v42 = vpop.xlane.xlu2 %627 }
  0xce   :  { %v1977_v35 = vpop.xlane.xlu1 %624 }
  0xcf   :  { %v1963_v49 = vpop.xlane.xlu0 %621 }
  0xd0   :  { %850 = vperm.xlu0 %1448, %v1826_v7  }
  0xd1   :  { %1433 = vset.pattern.permute.xlu2 %v1954_v36 }
  0xd4   :  { %934 = vperm.xlu1 %1434, %v1826_v7   ;;  %v1968_v11 = vpop.xlane.xlu2 %636 }
  0xd6   :  { %v1993_v27 = vpop.xlane.xlu1 %633 }
  0xd7   :  { %v1984_v52 = vpop.xlane.xlu0 %630  ;;  %1495 = vrsqrt.f32 %v1993_v27 }
  0xd8   :  { %1132 = vperm.xlu0 %1448, %v1966_v55   ;;  %1497 = vrsqrt.f32 %v1897_v63 }
  0xd9   :  { %928 = vperm.xlu2 %1433, %v1826_v7   ;;  %v359_v7 = vmul.f32 0.5, %v358_v44  ;;  %v1484_v44 = vpop.eup %1483  ;;  %1499 = vrsqrt.f32 %v1902_v60 }
  0xda   :  { %1501 = vrsqrt.f32 %v1919_v9 }
  0xdb   :  { %1503 = vrsqrt.f32 %v1940_v25 }
  0xdc   :  { %1436 = vset.pattern.permute.xlu1 %v848_v20  ;;  %v845_v4 = vpop.permute.xlu2 %844  ;;  %v352_v20 = vsel %vm351_vm2, %v1861_v53, %v350_v1  ;;  %v465_v1 = vmul.f32 %v1482_v17, %v1905_v3  ;;  %vm735_vm2 = vcmp.eq.f32.partialorder %v1938_v24, inf  ;;  %1505 = vrsqrt.f32 %v1946_v31 }
  0xdd   :  { %v1982_v5 = vmul.f32 %v845_v4, %v319_v39  ;;  %v355_v0 = vsel %vm353_vm3, %v354_v21, %v352_v20  ;;  %v360_v39 = vsub.f32 1.5, %v359_v7  ;;  %v336_v4 = vsub.f32 1.5, %v335_v22 }
  0xde   :  { %v466_v20 = vmul.f32 %v1482_v17, %v465_v1  ;;  %v369_v7 = vmul.f32 %v1484_v44, %v1856_v54  ;;  %v2009_v21 = vpop.xlane.xlu1 %642  ;;  %v366_v1 = vand.u32 2147483648, %v1844_v45  ;;  %vm447_vm3 = vcmp.eq.f32.partialorder %v1885_v10, inf }
  0xdf   :  { %v2000_v61 = vpop.xlane.xlu0 %639  ;;  %v361_v6 = vmul.f32 %v1478_v8, %v360_v39  ;;  %v337_v53 = vmul.f32 %v1480_v30, %v336_v4  ;;  %2433 = vst [vmem:[#allocation17_spill] sm:$0xff] %v2009_v21  ;;  %v412_v8 = vsel %vm411_vm4, %v1873_v56, %v410_v23  ;;  %v414_v30 = vand.u32 2147483648, %v1873_v56  ;;  %v1486_v39 = vpop.eup %1485 }
  0xe0   :  { %1457 = vset.pattern.permute.xlu0 %v1878_v58  ;;  %2432 = vst [vmem:[#allocation16_spill] sm:$0xff] %v2000_v61  ;;  %v467_v22 = vmul.f32 0.5, %v466_v20  ;;  %vm737_vm4 = vcmp.eq.f32.partialorder %v1938_v24, 0.0  ;;  %1507 = vrsqrt.f32 %v1925_v12 }
  0xe1   :  { %1435 = vset.pattern.permute.xlu2 %v1802_v37  ;;  %v362_v46 = vmul.f32 %v361_v6, %v1844_v45  ;;  %v338_v34 = vmul.f32 %v337_v53, %v1846_v51  ;;  %v415_v19 = vsel %vm413_vm6, %v414_v30, %v412_v8  ;;  %vm449_vm6 = vcmp.eq.f32.partialorder %v1885_v10, 0.0 }
  0xe2   :  { %v468_v56 = vsub.f32 1.5, %v467_v22  ;;  %v1488_v22 = vpop.eup %1487  ;;  %1509 = vrsqrt.f32 %v1880_v59 }
  0xe3   :  { %v340_v23 = vsel %vm339_vm8, %v1846_v51, %v338_v34  ;;  %vm795_vm8 = vcmp.eq.f32.partialorder %v1993_v27, inf  ;;  %1511 = vrsqrt.f32 %v1963_v49 }
  0xe4   :  { %981 = vperm.xlu1 %1436, %v1871_v41   ;;  %v863_v38 = vpop.permute.xlu2 %862  ;;  %1513 = vrsqrt.f32 %v1957_v18 }
  0xe5   :  { %v1997_v43 = vmul.f32 %v863_v38, %v355_v0  ;;  %v370_v0 = vmul.f32 %v1484_v44, %v369_v7  ;;  %v364_v38 = vsel %vm363_vm5, %v1844_v45, %v362_v46  ;;  %v342_v46 = vand.u32 2147483648, %v1846_v51 }
  0xe6   :  { %v367_v20 = vsel %vm365_vm7, %v366_v1, %v364_v38  ;;  %v669_v45 = vmul.f32 %v1486_v39, %v1931_v15  ;;  %vm435_vm5 = vcmp.eq.f32.partialorder %v1889_v14, inf  ;;  %vm437_vm7 = vcmp.eq.f32.partialorder %v1889_v14, 0.0 }
  0xe7   :  { %v371_v53 = vmul.f32 0.5, %v370_v0  ;;  %v343_v30 = vsel %vm341_vm9, %v342_v46, %v340_v23  ;;  %vm459_vm9 = vcmp.eq.f32.partialorder %v1902_v60, inf  ;;  %1515 = vrsqrt.f32 %v1887_v62 }
  0xe8   :  { %1162 = vperm.xlu0 %1457, %v1966_v55   ;;  %v670_v0 = vmul.f32 %v1486_v39, %v669_v45  ;;  %1517 = vrsqrt.f32 %v1950_v42 }
  0xe9   :  { %975 = vperm.xlu2 %1435, %v1871_v41   ;;  %v372_v34 = vsub.f32 1.5, %v371_v53  ;;  %1519 = vrsqrt.f32 %v1977_v35 }
  0xea   :  { %v671_v51 = vmul.f32 0.5, %v670_v0 }
  0xeb   :  { %v373_v1 = vmul.f32 %v1484_v44, %v372_v34 }
  0xec   :  { %1439 = vset.pattern.permute.xlu1 %v1849_v47  ;;  %v672_v44 = vsub.f32 1.5, %v671_v51 }
  0xf0   :  { %1462 = vset.pattern.permute.xlu0 %v1928_v13 }
  0xf1   :  { %1438 = vset.pattern.permute.xlu2 %v1830_v28 }
  0xf2   :  { %v893_v4 = vpop.permute.xlu0 %892 }
  0xf3   :  { %v2024_v6 = vmul.f32 %v893_v4, %v415_v19  ;;  %v869_v7 = vpop.permute.xlu2 %868  ;;  %v469_v4 = vmul.f32 %v1482_v17, %v468_v56  ;;  %v374_v17 = vmul.f32 %v373_v1, %v1856_v54  ;;  %v474_v56 = vand.u32 2147483648, %v1905_v3 }
  0xf4   :  { %999 = vperm.xlu1 %1439, %v1871_v41   ;;  %v2029_v8 = vmul.f32 %v869_v7, %v367_v20  ;;  %v393_v20 = vmul.f32 %v1488_v22, %v1875_v57 }
  0xf5   :  { %v470_v38 = vmul.f32 %v469_v4, %v1905_v3  ;;  %v376_v46 = vsel %vm375_vm12, %v1856_v54, %v374_v17  ;;  %v378_v4 = vand.u32 2147483648, %v1856_v54  ;;  %vm461_vm12 = vcmp.eq.f32.partialorder %v1902_v60, 0.0 }
  0xf6   :  { %v857_v61 = vpop.permute.xlu1 %856  ;;  %v394_v23 = vmul.f32 %v1488_v22, %v393_v20 }
  0xf7   :  { %v2033_v19 = vmul.f32 %v857_v61, %v343_v30  ;;  %v472_v61 = vsel %vm471_vm10, %v1905_v3, %v470_v38  ;;  %v1490_v30 = vpop.eup %1489  ;;  %v673_v3 = vmul.f32 %v1486_v39, %v672_v44  ;;  %v379_v0 = vsel %vm377_vm13, %v378_v4, %v376_v46 }
  0xf8   :  { %1192 = vperm.xlu0 %1462, %v1966_v55   ;;  %v395_v45 = vmul.f32 0.5, %v394_v23  ;;  %v1492_v34 = vpop.eup %1491  ;;  %v729_v51 = vmul.f32 %v1490_v30, %v1938_v24  ;;  %v678_v44 = vand.u32 2147483648, %v1931_v15  ;;  %vm483_vm10 = vcmp.eq.f32.partialorder %v1897_v63, inf }
  0xf9   :  { %993 = vperm.xlu2 %1438, %v1871_v41   ;;  %v674_v17 = vmul.f32 %v673_v3, %v1931_v15  ;;  %v441_v23 = vmul.f32 %v1492_v34, %v1885_v10  ;;  %vm485_vm13 = vcmp.eq.f32.partialorder %v1897_v63, 0.0  ;;  %1521 = vrsqrt.f32 %v1968_v11 }
  0xfa   :  { %v396_v20 = vsub.f32 1.5, %v395_v45  ;;  %v730_v54 = vmul.f32 %v1490_v30, %v729_v51  ;;  %1523 = vrsqrt.f32 %v1984_v52 }
  0xfc   :  { %1441 = vset.pattern.permute.xlu1 %v1878_v58  ;;  %v475_v58 = vsel %vm473_vm11, %v474_v56, %v472_v61  ;;  %v1494_v61 = vpop.eup %1493  ;;  %v397_v56 = vmul.f32 %v1488_v22, %v396_v20  ;;  %v731_v45 = vmul.f32 0.5, %v730_v54  ;;  %vm797_vm11 = vcmp.eq.f32.partialorder %v1993_v27, 0.0 }
  0xfd   :  { %v429_v39 = vmul.f32 %v1494_v61, %v1889_v14  ;;  %1525 = vrsqrt.f32 %v1915_v32 }
  0xfe   :  { %v398_v46 = vmul.f32 %v397_v56, %v1875_v57  ;;  %v732_v20 = vsub.f32 1.5, %v731_v45  ;;  %v402_v56 = vand.u32 2147483648, %v1875_v57 }
  0xff   :  { %v430_v22 = vmul.f32 %v1494_v61, %v429_v39 }
 0x100   :  { %v733_v45 = vmul.f32 %v1490_v30, %v732_v20 }
 0x101   :  { %1440 = vset.pattern.permute.xlu2 %v1840_v33  ;;  %v431_v51 = vmul.f32 0.5, %v430_v22 }
 0x102   :  { %v923_v53 = vpop.permute.xlu0 %922 }
 0x103   :  { %v2050_v7 = vmul.f32 %v923_v53, %v475_v58  ;;  %v676_v58 = vsel %vm675_vm14, %v1931_v15, %v674_v17  ;;  %v442_v53 = vmul.f32 %v1492_v34, %v441_v23  ;;  %v400_v15 = vsel %vm399_vm0, %v1875_v57, %v398_v46  ;;  %v1496_v17 = vpop.eup %1495  ;;  %v2077_v23 = vpop.permute.xlu2 %880 }
 0x104   :  { %1011 = vperm.xlu1 %1441, %v1871_v41   ;;  %v679_v4 = vsel %vm677_vm15, %v678_v44, %v676_v58  ;;  %v1498_v54 = vpop.eup %1497  ;;  %v432_v22 = vsub.f32 1.5, %v431_v51  ;;  %v734_v57 = vmul.f32 %v733_v45, %v1938_v24  ;;  %vm651_vm14 = vcmp.eq.f32.partialorder %v1919_v9, inf }
 0x105   :  { %2434 = vst [vmem:[#allocation18_spill] sm:$0xff] %v2050_v7  ;;  %v443_v3 = vmul.f32 0.5, %v442_v53  ;;  %v1500_v58 = vpop.eup %1499  ;;  %v403_v53 = vsel %vm401_vm1, %v402_v56, %v400_v15  ;;  %v477_v7 = vmul.f32 %v1498_v54, %v1897_v63  ;;  %vm653_vm15 = vcmp.eq.f32.partialorder %v1919_v9, 0.0 }
 0x106   :  { %v875_v38 = vpop.permute.xlu1 %874  ;;  %v453_v21 = vmul.f32 %v1500_v58, %v1902_v60  ;;  %vm687_vm0 = vcmp.eq.f32.partialorder %v1940_v25, inf  ;;  %vm689_vm1 = vcmp.eq.f32.partialorder %v1940_v25, 0.0 }
 0x107   :  { %v2056_v1 = vmul.f32 %v875_v38, %v379_v0  ;;  %v444_v39 = vsub.f32 1.5, %v443_v3  ;;  %v433_v3 = vmul.f32 %v1494_v61, %v432_v22  ;;  %v478_v15 = vmul.f32 %v1498_v54, %v477_v7 }
 0x108   :  { %v454_v20 = vmul.f32 %v1500_v58, %v453_v21  ;;  %v738_v61 = vand.u32 2147483648, %v1938_v24 }
 0x109   :  { %1005 = vperm.xlu2 %1440, %v1871_v41   ;;  %v434_v51 = vmul.f32 %v433_v3, %v1889_v14 }
 0x10c   :  { %1444 = vset.pattern.permute.xlu1 %v1900_v2  ;;  %v445_v2 = vmul.f32 %v1492_v34, %v444_v39  ;;  %v736_v34 = vsel %vm735_vm2, %v1938_v24, %v734_v57  ;;  %v479_v39 = vmul.f32 0.5, %v478_v15  ;;  %vm711_vm2 = vcmp.eq.f32.partialorder %v1946_v31, inf }
 0x10d   :  { %v739_v21 = vsel %vm737_vm4, %v738_v61, %v736_v34  ;;  %vm699_vm4 = vcmp.eq.f32.partialorder %v1925_v12, inf }
 0x10e   :  { %v446_v30 = vmul.f32 %v445_v2, %v1885_v10  ;;  %v455_v2 = vmul.f32 0.5, %v454_v20  ;;  %v480_v57 = vsub.f32 1.5, %v479_v39  ;;  %v1502_v20 = vpop.eup %1501 }
 0x110   :  { %v456_v15 = vsub.f32 1.5, %v455_v2  ;;  %v481_v61 = vmul.f32 %v1498_v54, %v480_v57  ;;  %v798_v54 = vand.u32 2147483648, %v1993_v27 }
 0x111   :  { %1443 = vset.pattern.permute.xlu2 %v1806_v48 }
 0x112   :  { %v988_v0 = vpop.permute.xlu0 %987 }
 0x113   :  { %v2074_v38 = vmul.f32 %v988_v0, %v679_v4  ;;  %v789_v0 = vmul.f32 %v1496_v17, %v1993_v27 }
 0x114   :  { %1029 = vperm.xlu1 %1444, %v1871_v41  }
 0x115   :  { %2435 = vst [vmem:[#allocation19_spill] sm:$0xff] %v2074_v38  ;;  %v790_v44 = vmul.f32 %v1496_v17, %v789_v0  ;;  %v2091_v38 = vpop.permute.xlu2 %898  ;;  %v438_v0 = vand.u32 2147483648, %v1889_v14 }
 0x116   :  { %v887_v4 = vpop.permute.xlu1 %886 }
 0x117   :  { %v2084_v46 = vmul.f32 %v887_v4, %v403_v53  ;;  %v791_v56 = vmul.f32 0.5, %v790_v44  ;;  %v450_v53 = vand.u32 2147483648, %v1885_v10  ;;  %v436_v4 = vsel %vm435_vm5, %v1889_v14, %v434_v51 }
 0x118   :  { %v482_v14 = vmul.f32 %v481_v61, %v1897_v63  ;;  %vm701_vm5 = vcmp.eq.f32.partialorder %v1925_v12, 0.0 }
 0x119   :  { %1023 = vperm.xlu2 %1443, %v1871_v41   ;;  %v792_v45 = vsub.f32 1.5, %v791_v56 }
 0x11b   :  { %v793_v56 = vmul.f32 %v1496_v17, %v792_v45 }
 0x11c   :  { %1446 = vset.pattern.permute.xlu1 %v1928_v13  ;;  %v448_v13 = vsel %vm447_vm3, %v1885_v10, %v446_v30  ;;  %v439_v10 = vsel %vm437_vm7, %v438_v0, %v436_v4  ;;  %v486_v0 = vand.u32 2147483648, %v1897_v63  ;;  %vm713_vm3 = vcmp.eq.f32.partialorder %v1946_v31, 0.0 }
 0x11d   :  { %v451_v24 = vsel %vm449_vm6, %v450_v53, %v448_v13  ;;  %v457_v13 = vmul.f32 %v1500_v58, %v456_v15  ;;  %v794_v39 = vmul.f32 %v793_v56, %v1993_v27  ;;  %v484_v58 = vsel %vm483_vm10, %v1897_v63, %v482_v14 }
 0x11e   :  { %v462_v53 = vand.u32 2147483648, %v1902_v60  ;;  %v487_v15 = vsel %vm485_vm13, %v486_v0, %v484_v58  ;;  %vm387_vm6 = vcmp.eq.f32.partialorder %v1880_v59, inf  ;;  %vm747_vm7 = vcmp.eq.f32.partialorder %v1963_v49, inf }
 0x11f   :  { %v458_v2 = vmul.f32 %v457_v13, %v1902_v60  ;;  %v796_v17 = vsel %vm795_vm8, %v1993_v27, %v794_v39  ;;  %vm389_vm8 = vcmp.eq.f32.partialorder %v1880_v59, 0.0  ;;  %vm723_vm10 = vcmp.eq.f32.partialorder %v1957_v18, inf }
 0x120   :  { %vm425_vm13 = vcmp.eq.f32.partialorder %v1887_v62, 0.0 }
 0x121   :  { %1445 = vset.pattern.permute.xlu2 %v1893_v16  ;;  %v460_v4 = vsel %vm459_vm9, %v1902_v60, %v458_v2  ;;  %v1504_v60 = vpop.eup %1503  ;;  %vm749_vm9 = vcmp.eq.f32.partialorder %v1963_v49, 0.0 }
 0x122   :  { %v1018_v7 = vpop.permute.xlu0 %1017  ;;  %v463_v27 = vsel %vm461_vm12, %v462_v53, %v460_v4  ;;  %v681_v39 = vmul.f32 %v1504_v60, %v1940_v25  ;;  %v1506_v4 = vpop.eup %1505  ;;  %vm423_vm12 = vcmp.eq.f32.partialorder %v1887_v62, inf }
 0x123   :  { %v2106_v44 = vmul.f32 %v1018_v7, %v739_v21  ;;  %v911_v22 = vpop.permute.xlu2 %910  ;;  %v645_v21 = vmul.f32 %v1502_v20, %v1919_v9  ;;  %v705_v0 = vmul.f32 %v1506_v4, %v1946_v31 }
 0x124   :  { %1041 = vperm.xlu1 %1446, %v1871_v41   ;;  %v2112_v3 = vmul.f32 %v911_v22, %v451_v24  ;;  %v799_v24 = vsel %vm797_vm11, %v798_v54, %v796_v17  ;;  %v682_v2 = vmul.f32 %v1504_v60, %v681_v39  ;;  %vm725_vm11 = vcmp.eq.f32.partialorder %v1957_v18, 0.0 }
 0x125   :  { %v646_v7 = vmul.f32 %v1502_v20, %v645_v21 }
 0x126   :  { %v905_v34 = vpop.permute.xlu1 %904  ;;  %v683_v17 = vmul.f32 0.5, %v682_v2 }
 0x127   :  { %v2117_v51 = vmul.f32 %v905_v34, %v439_v10  ;;  %v647_v45 = vmul.f32 0.5, %v646_v7 }
 0x128   :  { %v684_v53 = vsub.f32 1.5, %v683_v17 }
 0x129   :  { %1035 = vperm.xlu2 %1445, %v1871_v41   ;;  %v648_v56 = vsub.f32 1.5, %v647_v45 }
 0x12b   :  { %v649_v21 = vmul.f32 %v1502_v20, %v648_v56  ;;  %v654_v20 = vand.u32 2147483648, %v1919_v9 }
 0x12c   :  { %1450 = vset.pattern.permute.xlu1 %v1954_v36 }
 0x12d   :  { %v650_v63 = vmul.f32 %v649_v21, %v1919_v9 }
 0x12f   :  { %v652_v7 = vsel %vm651_vm14, %v1919_v9, %v650_v63  ;;  %vm771_vm14 = vcmp.eq.f32.partialorder %v1950_v42, inf }
 0x130   :  { %v655_v54 = vsel %vm653_vm15, %v654_v20, %v652_v7  ;;  %vm759_vm15 = vcmp.eq.f32.partialorder %v1977_v35, inf }
 0x131   :  { %1449 = vset.pattern.permute.xlu2 %v1836_v50 }
 0x132   :  { %v1048_v22 = vpop.permute.xlu0 %1047 }
 0x133   :  { %v2138_v57 = vmul.f32 %v1048_v22, %v799_v24  ;;  %v929_v10 = vpop.permute.xlu2 %928  ;;  %v1508_v24 = vpop.eup %1507  ;;  %v685_v22 = vmul.f32 %v1504_v60, %v684_v53 }
 0x134   :  { %1059 = vperm.xlu1 %1450, %v1871_v41   ;;  %v2142_v34 = vmul.f32 %v929_v10, %v487_v15  ;;  %v693_v15 = vmul.f32 %v1508_v24, %v1925_v12  ;;  %v706_v10 = vmul.f32 %v1506_v4, %v705_v0  ;;  %v1510_v39 = vpop.eup %1509 }
 0x135   :  { %v686_v9 = vmul.f32 %v685_v22, %v1940_v25  ;;  %v1512_v7 = vpop.eup %1511 }
 0x136   :  { %v917_v61 = vpop.permute.xlu1 %916  ;;  %v707_v60 = vmul.f32 0.5, %v706_v10  ;;  %v741_v53 = vmul.f32 %v1512_v7, %v1963_v49 }
 0x137   :  { %v2144_v13 = vmul.f32 %v917_v61, %v463_v27  ;;  %v694_v27 = vmul.f32 %v1508_v24, %v693_v15  ;;  %v688_v56 = vsel %vm687_vm0, %v1940_v25, %v686_v9  ;;  %vm773_vm0 = vcmp.eq.f32.partialorder %v1950_v42, 0.0 }
 0x138   :  { %v708_v2 = vsub.f32 1.5, %v707_v60  ;;  %v742_v10 = vmul.f32 %v1512_v7, %v741_v53 }
 0x139   :  { %1053 = vperm.xlu2 %1449, %v1871_v41  }
 0x13c   :  { %1452 = vset.pattern.permute.xlu1 %v1802_v37 }
 0x141   :  { %1451 = vset.pattern.permute.xlu2 %v1943_v26 }
 0x143   :  { %v976_v37 = vpop.permute.xlu2 %975 }
 0x144   :  { %1126 = vperm.xlu1 %1452, %v1966_v55   ;;  %v2160_v58 = vmul.f32 %v976_v37, %v655_v54  ;;  %v1514_v37 = vpop.eup %1513  ;;  %v381_v54 = vmul.f32 %v1510_v39, %v1880_v59 }
 0x145   :  { %v717_v0 = vmul.f32 %v1514_v37, %v1957_v18 }
 0x146   :  { %v1104_v45 = vsub.f32 %v1982_v5, %v2160_v58  ;;  %v2180_v17 = vpop.permute.xlu1 %934  ;;  %v382_v15 = vmul.f32 %v1510_v39, %v381_v54  ;;  %v702_v54 = vand.u32 2147483648, %v1925_v12 }
 0x148   :  { %v383_v60 = vmul.f32 0.5, %v382_v15 }
 0x149   :  { %1065 = vperm.xlu2 %1451, %v1871_v41   ;;  %v690_v41 = vand.u32 2147483648, %v1940_v25  ;;  %v709_v25 = vmul.f32 %v1506_v4, %v708_v2 }
 0x14b   :  { %v691_v21 = vsel %vm689_vm1, %v690_v41, %v688_v56  ;;  %v710_v9 = vmul.f32 %v709_v25, %v1946_v31  ;;  %v718_v56 = vmul.f32 %v1514_v37, %v717_v0  ;;  %v743_v41 = vmul.f32 0.5, %v742_v10 }
 0x14c   :  { %1454 = vset.pattern.permute.xlu1 %v1830_v28  ;;  %v695_v28 = vmul.f32 0.5, %v694_v27  ;;  %vm761_vm1 = vcmp.eq.f32.partialorder %v1977_v35, 0.0 }
 0x14e   :  { %v696_v20 = vsub.f32 1.5, %v695_v28 }
 0x150   :  { %v697_v22 = vmul.f32 %v1508_v24, %v696_v20  ;;  %v714_v24 = vand.u32 2147483648, %v1946_v31 }
 0x151   :  { %1453 = vset.pattern.permute.xlu2 %v1816_v29 }
 0x152   :  { %v698_v4 = vmul.f32 %v697_v22, %v1925_v12 }
 0x153   :  { %v994_v61 = vpop.permute.xlu2 %993 }
 0x154   :  { %1144 = vperm.xlu1 %1454, %v1966_v55   ;;  %v2178_v63 = vmul.f32 %v994_v61, %v691_v21  ;;  %v700_v28 = vsel %vm699_vm4, %v1925_v12, %v698_v4  ;;  %v719_v61 = vmul.f32 0.5, %v718_v56  ;;  %v2203_v21 = vpop.eup %1515  ;;  %vm809_vm4 = vcmp.eq.f32.partialorder %v1968_v11, 0.0 }
 0x155   :  { %v1518_v25 = vpop.eup %1517  ;;  %v703_v22 = vsel %vm701_vm5, %v702_v54, %v700_v28  ;;  %v417_v56 = vmul.f32 %v2203_v21, %v1887_v62  ;;  %vm785_vm5 = vcmp.eq.f32.partialorder %v1984_v52, 0.0 }
 0x156   :  { %v2191_v27 = vpop.permute.xlu1 %981  ;;  %v1520_v4 = vpop.eup %1519 }
 0x157   :  { %v753_v28 = vmul.f32 %v1520_v4, %v1977_v35 }
 0x159   :  { %1138 = vperm.xlu2 %1453, %v1966_v55  }
 0x15c   :  { %1456 = vset.pattern.permute.xlu1 %v1840_v33  ;;  %v712_v33 = vsel %vm711_vm2, %v1946_v31, %v710_v9  ;;  %v384_v31 = vsub.f32 1.5, %v383_v60  ;;  %v720_v9 = vsub.f32 1.5, %v719_v61  ;;  %v418_v61 = vmul.f32 %v2203_v21, %v417_v56 }
 0x15d   :  { %v715_v20 = vsel %vm713_vm3, %v714_v24, %v712_v33  ;;  %v765_v24 = vmul.f32 %v1518_v25, %v1950_v42  ;;  %vm807_vm2 = vcmp.eq.f32.partialorder %v1968_v11, inf  ;;  %vm783_vm3 = vcmp.eq.f32.partialorder %v1984_v52, inf }
 0x15e   :  { %v385_v60 = vmul.f32 %v1510_v39, %v384_v31  ;;  %v419_v31 = vmul.f32 0.5, %v418_v61 }
 0x161   :  { %1455 = vset.pattern.permute.xlu2 %v1849_v47  ;;  %v744_v47 = vsub.f32 1.5, %v743_v41  ;;  %v721_v41 = vmul.f32 %v1514_v37, %v720_v9  ;;  %v390_v37 = vand.u32 2147483648, %v1880_v59 }
 0x163   :  { %v1006_v2 = vpop.permute.xlu2 %1005  ;;  %v745_v33 = vmul.f32 %v1512_v7, %v744_v47  ;;  %v722_v39 = vmul.f32 %v721_v41, %v1957_v18  ;;  %v754_v7 = vmul.f32 %v1520_v4, %v753_v28  ;;  %v750_v47 = vand.u32 2147483648, %v1963_v49  ;;  %v2241_v28 = vpop.eup %1521 }
 0x164   :  { %1156 = vperm.xlu1 %1456, %v1966_v55   ;;  %v2207_v53 = vmul.f32 %v1006_v2, %v715_v20  ;;  %v766_v2 = vmul.f32 %v1518_v25, %v765_v24  ;;  %v386_v20 = vmul.f32 %v385_v60, %v1880_v59  ;;  %v420_v60 = vsub.f32 1.5, %v419_v31 }
 0x165   :  { %v746_v54 = vmul.f32 %v745_v33, %v1963_v49  ;;  %v724_v9 = vsel %vm723_vm10, %v1957_v18, %v722_v39  ;;  %v755_v56 = vmul.f32 0.5, %v754_v7 }
 0x166   :  { %v1000_v0 = vpop.permute.xlu1 %999  ;;  %v421_v31 = vmul.f32 %v2203_v21, %v420_v60  ;;  %v2437_v60 = vld [vmem:[#allocation17_spill] sm:$0xff] }
 0x167   :  { %v2210_v15 = vmul.f32 %v1000_v0, %v703_v22  ;;  %v388_v22 = vsel %vm387_vm6, %v1880_v59, %v386_v20  ;;  %v748_v0 = vsel %vm747_vm7, %v1963_v49, %v746_v54  ;;  %v726_v59 = vand.u32 2147483648, %v1957_v18 }
 0x168   :  { %v391_v24 = vsel %vm389_vm8, %v390_v37, %v388_v22  ;;  %v751_v41 = vsel %vm749_vm9, %v750_v47, %v748_v0  ;;  %v756_v39 = vsub.f32 1.5, %v755_v56  ;;  %v1524_v37 = vpop.eup %1523  ;;  %v801_v18 = vmul.f32 %v2241_v28, %v1968_v11  ;;  %v2441_v47 = vld [vmem:[#allocation14_spill] sm:$0xff] }
 0x169   :  { %1150 = vperm.xlu2 %1455, %v1966_v55   ;;  %v727_v61 = vsel %vm725_vm11, %v726_v59, %v724_v9  ;;  %v2247_v20 = vmul.f32 %v2077_v23, %v391_v24  ;;  %v422_v0 = vmul.f32 %v421_v31, %v1887_v62  ;;  %v426_v56 = vand.u32 2147483648, %v1887_v62 }
 0x16a   :  { %v757_v23 = vmul.f32 %v1520_v4, %v756_v39  ;;  %v802_v9 = vmul.f32 %v2241_v28, %v801_v18  ;;  %vm495_vm6 = vcmp.eq.f32.partialorder %v1915_v32, inf  ;;  %vm497_vm8 = vcmp.eq.f32.partialorder %v1915_v32, 0.0 }
 0x16b   :  { %vm831_vm11 = vcmp.eq.f32.partialorder %v2437_v60, inf }
 0x16c   :  { %1459 = vset.pattern.permute.xlu1 %v1806_v48  ;;  %v767_v48 = vmul.f32 0.5, %v766_v2  ;;  %v758_v4 = vmul.f32 %v757_v23, %v1977_v35  ;;  %v803_v59 = vmul.f32 0.5, %v802_v9 }
 0x16e   :  { %v804_v9 = vsub.f32 1.5, %v803_v59 }
 0x171   :  { %1458 = vset.pattern.permute.xlu2 %v1867_v40  ;;  %v768_v40 = vsub.f32 1.5, %v767_v48  ;;  %v777_v48 = vmul.f32 %v1524_v37, %v1984_v52 }
 0x173   :  { %v1024_v33 = vpop.permute.xlu2 %1023  ;;  %v769_v22 = vmul.f32 %v1518_v25, %v768_v40  ;;  %v2436_v25 = vld [vmem:[#allocation15_spill] sm:$0xff]  ;;  %v778_v24 = vmul.f32 %v1524_v37, %v777_v48  ;;  %v2439_v40 = vld [vmem:[#allocation16_spill] sm:$0xff]  ;;  %v762_v48 = vand.u32 2147483648, %v1977_v35 }
 0x174   :  { %1174 = vperm.xlu1 %1459, %v1966_v55   ;;  %v2243_v49 = vmul.f32 %v1024_v33, %v751_v41  ;;  %1527 = vrsqrt.f32 %v2436_v25  ;;  %v424_v33 = vsel %vm423_vm12, %v1887_v62, %v422_v0  ;;  %v760_v62 = vsel %vm759_vm15, %v1977_v35, %v758_v4 }
 0x175   :  { %v770_v21 = vmul.f32 %v769_v22, %v1950_v42  ;;  %1529 = vrsqrt.f32 %v2437_v60  ;;  %v427_v39 = vsel %vm425_vm13, %v426_v56, %v424_v33  ;;  %v779_v31 = vmul.f32 0.5, %v778_v24  ;;  %v1526_v22 = vpop.eup %1525 }
 0x176   :  { %v1012_v2 = vpop.permute.xlu1 %1011  ;;  %v2287_v56 = vmul.f32 %v2091_v38, %v427_v39  ;;  %v489_v33 = vmul.f32 %v1526_v22, %v1915_v32  ;;  %v805_v35 = vmul.f32 %v2241_v28, %v804_v9  ;;  %vm663_vm7 = vcmp.eq.f32.partialorder %v2436_v25, inf }
 0x177   :  { %v2249_v54 = vmul.f32 %v1012_v2, %v727_v61  ;;  %v772_v41 = vsel %vm771_vm14, %v1950_v42, %v770_v21  ;;  %v2440_v61 = vld [vmem:[#allocation13_spill] sm:$0xff]  ;;  %v774_v2 = vand.u32 2147483648, %v1950_v42  ;;  %v763_v42 = vsel %vm761_vm1, %v762_v48, %v760_v62 }
 0x178   :  { %v490_v62 = vmul.f32 %v1526_v22, %v489_v33  ;;  %v806_v28 = vmul.f32 %v805_v35, %v1968_v11  ;;  %vm665_vm10 = vcmp.eq.f32.partialorder %v2436_v25, 0.0  ;;  %vm819_vm12 = vcmp.eq.f32.partialorder %v2439_v40, inf }
 0x179   :  { %1168 = vperm.xlu2 %1458, %v1966_v55   ;;  %v775_v18 = vsel %vm773_vm0, %v774_v2, %v772_v41  ;;  %v780_v41 = vsub.f32 1.5, %v779_v31  ;;  %vm833_vm13 = vcmp.eq.f32.partialorder %v2437_v60, 0.0  ;;  %vm821_vm15 = vcmp.eq.f32.partialorder %v2439_v40, 0.0 }
 0x17a   :  { %v1528_v0 = vpop.eup %1527  ;;  %v491_v7 = vmul.f32 0.5, %v490_v62  ;;  %v808_v33 = vsel %vm807_vm2, %v1968_v11, %v806_v28  ;;  %v2447_v5 = vsub.f32 %v2247_v20, %v2249_v54  ;;  %vm1335_vm0 = vcmask 130112  }
 0x17b   :  { %v781_v48 = vmul.f32 %v1524_v37, %v780_v41  ;;  %vm1339_vm1 = vcmask 195712   ;;  %vm1343_vm2 = vcmask 261312  }
 0x17c   :  { %1461 = vset.pattern.permute.xlu1 %v1893_v16  ;;  %v2438_v16 = vld [vmem:[#allocation12_spill] sm:$0xff]  ;;  %v492_v35 = vsub.f32 1.5, %v491_v7 }
 0x17d   :  { %1531 = vrsqrt.f32 %v2438_v16  ;;  %v782_v38 = vmul.f32 %v781_v48, %v1984_v52  ;;  %vm327_vm9 = vcmp.eq.f32.partialorder %v2438_v16, inf  ;;  %vm329_vm14 = vcmp.eq.f32.partialorder %v2438_v16, 0.0 }
 0x17e   :  { %1533 = vrsqrt.f32 %v2439_v40 }
 0x181   :  { %1460 = vset.pattern.permute.xlu2 %v2440_v61  ;;  %v1530_v61 = vpop.eup %1529 }
 0x182   :  { %v825_v59 = vmul.f32 %v1530_v61, %v2437_v60 }
 0x183   :  { %v1036_v23 = vpop.permute.xlu2 %1035  ;;  %v1532_v24 = vpop.eup %1531 }
 0x184   :  { %1186 = vperm.xlu1 %1461, %v1966_v55   ;;  %v2283_v21 = vmul.f32 %v1036_v23, %v775_v18  ;;  %v1534_v18 = vpop.eup %1533  ;;  %v657_v23 = vmul.f32 %v1528_v0, %v2436_v25  ;;  %v321_v39 = vmul.f32 %v1532_v24, %v2438_v16  ;;  %v826_v9 = vmul.f32 %v1530_v61, %v825_v59 }
 0x185   :  { %v813_v31 = vmul.f32 %v1534_v18, %v2439_v40  ;;  %v784_v59 = vsel %vm783_vm3, %v1984_v52, %v782_v38  ;;  %v2442_v38 = vld [vmem:[#allocation18_spill] sm:$0xff]  ;;  %vm1347_vm3 = vcmask 326912  }
 0x186   :  { %v1030_v4 = vpop.permute.xlu1 %1029  ;;  %v322_v2 = vmul.f32 %v1532_v24, %v321_v39  ;;  %v827_v41 = vmul.f32 0.5, %v826_v9 }
 0x187   :  { %v2290_v14 = vmul.f32 %v1030_v4, %v763_v42  ;;  %v1642_v42 = vmov 0   ;;  %v658_v4 = vmul.f32 %v1528_v0, %v657_v23  ;;  %v814_v10 = vmul.f32 %v1534_v18, %v813_v31 }
 0x188   :  { %1467 = vset.pattern.permute.xlu0 %v1642_v42  ;;  %v323_v30 = vmul.f32 0.5, %v322_v2  ;;  %v786_v23 = vand.u32 2147483648, %v1984_v52 }
 0x189   :  { %1180 = vperm.xlu2 %1460, %v1966_v55   ;;  %v659_v37 = vmul.f32 0.5, %v658_v4  ;;  %v815_v39 = vmul.f32 0.5, %v814_v10  ;;  %v2450_v20 = vsub.f32 %v2287_v56, %v2290_v14  ;;  %v2452_v14 = vsub.f32 %v2144_v13, %v2138_v57 }
 0x18a   :  { %v324_v4 = vsub.f32 1.5, %v323_v30  ;;  %v787_v9 = vsel %vm785_vm5, %v786_v23, %v784_v59  ;;  %v851_v59 = vpop.permute.xlu0 %850  ;;  %vm1355_vm5 = vcmask 458112  }
 0x18b   :  { %v660_v31 = vsub.f32 1.5, %v659_v37  ;;  %v816_v7 = vsub.f32 1.5, %v815_v39 }
 0x18c   :  { %1464 = vset.pattern.permute.xlu1 %v1836_v50  ;;  %v810_v50 = vand.u32 2147483648, %v1968_v11  ;;  %v493_v11 = vmul.f32 %v1526_v22, %v492_v35  ;;  %v325_v37 = vmul.f32 %v1532_v24, %v324_v4 }
 0x18d   :  { %v661_v52 = vmul.f32 %v1528_v0, %v660_v31  ;;  %v817_v30 = vmul.f32 %v1534_v18, %v816_v7  ;;  %v498_v0 = vand.u32 2147483648, %v1915_v32  ;;  %v666_v18 = vand.u32 2147483648, %v2436_v25 }
 0x18e   :  { %v811_v62 = vsel %vm809_vm4, %v810_v50, %v808_v33  ;;  %vm1351_vm4 = vcmask 392512  }
 0x18f   :  { %v662_v22 = vmul.f32 %v661_v52, %v2436_v25  ;;  %v818_v24 = vmul.f32 %v817_v30, %v2439_v40 }
 0x191   :  { %1463 = vset.pattern.permute.xlu2 %v2441_v47  ;;  %v828_v47 = vsub.f32 1.5, %v827_v41  ;;  %v494_v41 = vmul.f32 %v493_v11, %v1915_v32 }
 0x192   :  { %v1133_v30 = vpop.permute.xlu0 %1132 }
 0x193   :  { %v1054_v48 = vpop.permute.xlu2 %1053  ;;  %v829_v33 = vmul.f32 %v1530_v61, %v828_v47  ;;  %v326_v61 = vmul.f32 %v325_v37, %v2438_v16  ;;  %v496_v23 = vsel %vm495_vm6, %v1915_v32, %v494_v41  ;;  %v330_v32 = vand.u32 2147483648, %v2438_v16 }
 0x194   :  { %1204 = vperm.xlu1 %1464, %v1966_v55   ;;  %v2316_v2 = vmul.f32 %v1054_v48, %v811_v62  ;;  %v499_v39 = vsel %vm497_vm8, %v498_v0, %v496_v23  ;;  %v834_v62 = vand.u32 2147483648, %v2437_v60  ;;  %v822_v48 = vand.u32 2147483648, %v2439_v40 }
 0x195   :  { %v830_v50 = vmul.f32 %v829_v33, %v2437_v60  ;;  %v328_v31 = vsel %vm327_vm9, %v2438_v16, %v326_v61  ;;  %v820_v47 = vsel %vm819_vm12, %v2439_v40, %v818_v24  ;;  %vm1359_vm6 = vcmask 523712  }
 0x196   :  { %v1042_v28 = vpop.permute.xlu1 %1041  ;;  %v1117_v12 = vsub.f32 %v2442_v38, %v2316_v2  ;;  %v331_v7 = vsel %vm329_vm14, %v330_v32, %v328_v31  ;;  %v823_v52 = vsel %vm821_vm15, %v822_v48, %v820_v47  ;;  %vm1367_vm8 = vcmask 654912  }
 0x197   :  { %v2318_v29 = vmul.f32 %v1042_v28, %v787_v9  ;;  %v832_v35 = vsel %vm831_vm11, %v2437_v60, %v830_v50  ;;  %v953_v33 = vmul.f32 %v851_v59, %v331_v7  ;;  %v2443_v50 = vld [vmem:[#allocation19_spill] sm:$0xff]  ;;  %vm1371_vm9 = vcmask 720512  }
 0x198   :  { %v835_v9 = vsel %vm833_vm13, %v834_v62, %v832_v35  ;;  %v2444_v0 = vsub.f32 %v2033_v19, %v2443_v50  ;;  %v2446_v19 = vsub.f32 %v1997_v43, %v2178_v63  ;;  %v2449_v43 = vsub.f32 %v2056_v1, %v2207_v53 }
 0x199   :  { %v1115_v10 = vsub.f32 %v2112_v3, %v2318_v29  ;;  %1198 = vperm.xlu2 %1463, %v1966_v55   ;;  %vm1379_vm11 = vcmask 851712   ;;  %vm1383_vm12 = vcmask 917312   ;;  %vm1387_vm13 = vcmask 982912  }
 0x19a   :  { %v1163_v62 = vpop.permute.xlu0 %1162  ;;  %vm1391_vm14 = vcmask 1048512  }
 0x19b   :  { %v1240_v58 = vadd.f32 %v1163_v62, %v2447_v5 }
 0x19c   :  { %1466 = vset.pattern.permute.xlu1 %v1943_v26  ;;  %v664_v26 = vsel %vm663_vm7, %v2436_v25, %v662_v22  ;;  %vm1363_vm7 = vcmask 589312  }
 0x19d   :  { %v667_v4 = vsel %vm665_vm10, %v666_v18, %v664_v26  ;;  %v2445_v18 = vsub.f32 %v2029_v8, %v2210_v15  ;;  %v2448_v8 = vsub.f32 %v2084_v46, %v2106_v44  ;;  %v2451_v46 = vsub.f32 %v2024_v6, %v2243_v49 }
 0x19e   :  { %v1084_v60 = vmul.f32 %v2191_v27, %v667_v4  ;;  %v2453_v6 = vsub.f32 %v2117_v51, %v2283_v21  ;;  %vm1375_vm10 = vcmask 786112  }
 0x1a0   :  { %v1105_v40 = vsub.f32 %v953_v33, %v1084_v60 }
 0x1a1   :  { %1465 = vset.pattern.permute.xlu2 %v1954_v36  ;;  %v2356_v36 = vmul.f32 %v2180_v17, %v499_v39 }
 0x1a2   :  { %v1235_v17 = vadd.f32 %v1133_v30, %v1105_v40 }
 0x1a3   :  { %v1066_v28 = vpop.permute.xlu2 %1065 }
 0x1a4   :  { %1216 = vperm.xlu1 %1466, %v1966_v55   ;;  %v2359_v11 = vmul.f32 %v1066_v28, %v835_v9  ;;  %v1251_v27 = vmax.f32 %v1235_v17, 0.0 }
 0x1a6   :  { %v1060_v16 = vpop.permute.xlu1 %1059  ;;  %v1119_v25 = vsub.f32 %v2356_v36, %v2359_v11 }
 0x1a7   :  { %v1097_v37 = vmul.f32 %v1060_v16, %v823_v52  ;;  %v1193_v16 = vpop.permute.xlu0 %1192 }
 0x1a8   :  { %v1245_v1 = vadd.f32 %v1193_v16, %v1115_v10 }
 0x1a9   :  { %v1118_v41 = vsub.f32 %v2142_v34, %v1097_v37  ;;  %1210 = vperm.xlu2 %1465, %v1966_v55  }
 0x1aa   :  { %v1261_v53 = vmax.f32 %v1245_v1, 0.0 }
 0x1ac   :  { %1469 = vset.pattern.permute.xlu1 %v1642_v42 }
 0x1b1   :  { %1468 = vset.pattern.permute.xlu2 %v1642_v42 }
 0x1b2   :  { %1286 = vperm.xlu2 %1468, %v1251_v27  }
 0x1b3   :  { %v1139_v22 = vpop.permute.xlu2 %1138 }
 0x1b4   :  { %v1236_v61 = vadd.f32 %v1139_v22, %v2444_v0  ;;  %v2454_v0 = vlaneseq }
 0x1b6   :  { %v1127_v23 = vpop.permute.xlu1 %1126  ;;  %v1252_v24 = vmax.f32 %v1236_v61, 0.0  ;;  %v1331_v61 = vand.u32 127, %v2454_v0 }
 0x1b7   :  { %v1234_v34 = vadd.f32 %v1127_v23, %v1104_v45  ;;  %v1256_v45 = vmax.f32 %v1240_v58, 0.0 }
 0x1b8   :  { %1289 = vperm.xlu1 %1469, %v1252_v24   ;;  %v1333_v23 = vadd.s32 4294967288, %v1331_v61  ;;  %v1337_v38 = vadd.s32 4294967280, %v1331_v61  ;;  %v1349_v11 = vadd.s32 4294967256, %v1331_v61  ;;  %v1353_v62 = vadd.s32 4294967248, %v1331_v61 }
 0x1b9   :  { %v1250_v26 = vmax.f32 %v1234_v34, 0.0  ;;  %v1373_v16 = vadd.s32 4294967208, %v1331_v61 }
 0x1bb   :  { %1283 = vperm.xlu0 %1467, %v1250_v26  }
 0x1c3   :  { %v1151_v55 = vpop.permute.xlu2 %1150 }
 0x1c4   :  { %v1238_v42 = vadd.f32 %v1151_v55, %v2445_v18  ;;  %v1345_v55 = vadd.s32 4294967264, %v1331_v61  ;;  %v1341_v18 = vadd.s32 4294967272, %v1331_v61 }
 0x1c6   :  { %v1145_v35 = vpop.permute.xlu1 %1144  ;;  %v1254_v32 = vmax.f32 %v1238_v42, 0.0 }
 0x1c7   :  { %v1237_v59 = vadd.f32 %v1145_v35, %v2446_v19 }
 0x1c8   :  { %1295 = vperm.xlu1 %1469, %v1254_v32  }
 0x1c9   :  { %v1253_v39 = vmax.f32 %v1237_v59, 0.0 }
 0x1cb   :  { %1292 = vperm.xlu2 %1468, %v1253_v39  }
 0x1d3   :  { %1301 = vperm.xlu2 %1468, %v1256_v45   ;;  %v1169_v48 = vpop.permute.xlu2 %1168 }
 0x1d4   :  { %v1241_v15 = vadd.f32 %v1169_v48, %v2448_v8  ;;  %v1361_v48 = vadd.s32 4294967232, %v1331_v61  ;;  %v1357_v8 = vadd.s32 4294967240, %v1331_v61 }
 0x1d6   :  { %v1157_v31 = vpop.permute.xlu1 %1156  ;;  %v1257_v47 = vmax.f32 %v1241_v15, 0.0 }
 0x1d7   :  { %v1239_v63 = vadd.f32 %v1157_v31, %v2449_v43 }
 0x1d8   :  { %1304 = vperm.xlu1 %1469, %v1257_v47  }
 0x1d9   :  { %v1255_v4 = vmax.f32 %v1239_v63, 0.0  ;;  %v1369_v63 = vadd.s32 4294967216, %v1331_v61 }
 0x1db   :  { %1298 = vperm.xlu0 %1467, %v1255_v4   ;;  %v1365_v4 = vadd.s32 4294967224, %v1331_v61 }
 0x1e3   :  { %v1181_v28 = vpop.permute.xlu2 %1180 }
 0x1e4   :  { %v1243_v54 = vadd.f32 %v1181_v28, %v2450_v20 }
 0x1e6   :  { %v1175_v9 = vpop.permute.xlu1 %1174  ;;  %v1259_v60 = vmax.f32 %v1243_v54, 0.0 }
 0x1e7   :  { %v1242_v44 = vadd.f32 %v1175_v9, %v2451_v46 }
 0x1e8   :  { %1310 = vperm.xlu2 %1468, %v1259_v60  }
 0x1e9   :  { %v1258_v7 = vmax.f32 %v1242_v44, 0.0 }
 0x1eb   :  { %1307 = vperm.xlu0 %1467, %v1258_v7  }
 0x1f3   :  { %1316 = vperm.xlu0 %1467, %v1261_v53   ;;  %v1199_v52 = vpop.permute.xlu2 %1198  ;;  %v1377_v53 = vadd.s32 4294967200, %v1331_v61 }
 0x1f4   :  { %v1246_v56 = vadd.f32 %v1199_v52, %v2452_v14 }
 0x1f6   :  { %v1187_v33 = vpop.permute.xlu1 %1186  ;;  %v1262_v37 = vmax.f32 %v1246_v56, 0.0  ;;  %v1381_v56 = vadd.s32 4294967192, %v1331_v61 }
 0x1f7   :  { %v1244_v49 = vadd.f32 %v1187_v33, %v2453_v6  ;;  %v1385_v33 = vadd.s32 4294967184, %v1331_v61  ;;  %v1389_v6 = vadd.s32 4294967176, %v1331_v61 }
 0x1f8   :  { %1319 = vperm.xlu2 %1468, %v1262_v37  }
 0x1f9   :  { %v1260_v40 = vmax.f32 %v1244_v49, 0.0 }
 0x1fb   :  { %1313 = vperm.xlu1 %1469, %v1260_v40  }
 0x203   :  { %v1211_v30 = vpop.permute.xlu2 %1210 }
 0x204   :  { %v1248_v17 = vadd.f32 %v1211_v30, %v1118_v41 }
 0x206   :  { %v1205_v3 = vpop.permute.xlu1 %1204  ;;  %v1264_v29 = vmax.f32 %v1248_v17, 0.0 }
 0x207   :  { %v1247_v10 = vadd.f32 %v1205_v3, %v1117_v12 }
 0x208   :  { %1325 = vperm.xlu0 %1467, %v1264_v29  }
 0x209   :  { %v1263_v27 = vmax.f32 %v1247_v10, 0.0 }
 0x20b   :  { %1322 = vperm.xlu1 %1469, %v1263_v27  }
 0x20c   :  { %v1287_v21 = vpop.permute.xlu2 %1286 }
 0x20d   :  { %v1334_v34 = vperm.slane %v1287_v21, %v1333_v23 }
 0x216   :  { %v1217_v57 = vpop.permute.xlu1 %1216 }
 0x217   :  { %v1249_v51 = vadd.f32 %v1217_v57, %v1119_v25 }
 0x219   :  { %v1265_v13 = vmax.f32 %v1249_v51, 0.0 }
 0x21b   :  { %1328 = vperm.xlu2 %1468, %v1265_v13  }
 0x225   :  { %v1293_v41 = vpop.permute.xlu2 %1292 }
 0x226   :  { %v1342_v32 = vperm.slane %v1293_v41, %v1341_v18 }
 0x22a   :  { %v1290_v22 = vpop.permute.xlu1 %1289 }
 0x22b   :  { %v1338_v25 = vperm.slane %v1290_v22, %v1337_v38 }
 0x22d   :  { %v1284_v50 = vpop.permute.xlu0 %1283  ;;  %v1302_v26 = vpop.permute.xlu2 %1301 }
 0x22e   :  { %v1332_v24 = vperm.slane %v1284_v50, %v1331_v61  ;;  %v1354_v31 = vperm.slane %v1302_v26, %v1353_v62 }
 0x230   :  { %v1336_v36 = vsel %vm1335_vm0, %v1334_v34, %v1332_v24 }
 0x231   :  { %v1340_v42 = vsel %vm1339_vm1, %v1338_v25, %v1336_v36 }
 0x232   :  { %v1344_v5 = vsel %vm1343_vm2, %v1342_v32, %v1340_v42 }
 0x23a   :  { %v1296_v2 = vpop.permute.xlu1 %1295 }
 0x23b   :  { %v1346_v35 = vperm.slane %v1296_v2, %v1345_v55 }
 0x23d   :  { %v1348_v58 = vsel %vm1347_vm3, %v1346_v35, %v1344_v5 }
 0x242   :  { %v1311_v45 = vpop.permute.xlu2 %1310 }
 0x243   :  { %v1366_v7 = vperm.slane %v1311_v45, %v1365_v4 }
 0x24a   :  { %v1305_v19 = vpop.permute.xlu1 %1304 }
 0x24b   :  { %v1358_v28 = vperm.slane %v1305_v19, %v1357_v8 }
 0x24d   :  { %v1299_v12 = vpop.permute.xlu0 %1298 }
 0x24e   :  { %v1350_v59 = vperm.slane %v1299_v12, %v1349_v11 }
 0x250   :  { %v1352_v15 = vsel %vm1351_vm4, %v1350_v59, %v1348_v58 }
 0x251   :  { %v1356_v47 = vsel %vm1355_vm5, %v1354_v31, %v1352_v15 }
 0x252   :  { %v1360_v54 = vsel %vm1359_vm6, %v1358_v28, %v1356_v47  ;;  %v1320_v60 = vpop.permute.xlu2 %1319 }
 0x253   :  { %v1378_v40 = vperm.slane %v1320_v60, %v1377_v53 }
 0x25d   :  { %v1308_v39 = vpop.permute.xlu0 %1307 }
 0x25e   :  { %v1362_v43 = vperm.slane %v1308_v39, %v1361_v48 }
 0x260   :  { %v1364_v46 = vsel %vm1363_vm7, %v1362_v43, %v1360_v54 }
 0x261   :  { %v1368_v1 = vsel %vm1367_vm8, %v1366_v7, %v1364_v46 }
 0x265   :  { %v1317_v9 = vpop.permute.xlu0 %1316 }
 0x266   :  { %v1374_v14 = vperm.slane %v1317_v9, %v1373_v16 }
 0x26d   :  { %v1314_v20 = vpop.permute.xlu1 %1313 }
 0x26e   :  { %v1370_v44 = vperm.slane %v1314_v20, %v1369_v63 }
 0x270   :  { %v1372_v52 = vsel %vm1371_vm9, %v1370_v44, %v1368_v1 }
 0x271   :  { %v1376_v37 = vsel %vm1375_vm10, %v1374_v14, %v1372_v52 }
 0x272   :  { %v1380_v10 = vsel %vm1379_vm11, %v1378_v40, %v1376_v37 }
 0x275   :  { %v1329_v30 = vpop.permute.xlu2 %1328 }
 0x276   :  { %v1390_v27 = vperm.slane %v1329_v30, %v1389_v6 }
 0x27a   :  { %v1326_v49 = vpop.permute.xlu0 %1325 }
 0x27b   :  { %v1386_v29 = vperm.slane %v1326_v49, %v1385_v33 }
 0x27d   :  { %v1323_v17 = vpop.permute.xlu1 %1322 }
 0x27e   :  { %v1382_v3 = vperm.slane %v1323_v17, %v1381_v56 }
 0x280   :  { %v1384_v57 = vsel %vm1383_vm12, %v1382_v3, %v1380_v10 }
 0x281   :  { %v1388_v51 = vsel %vm1387_vm13, %v1386_v29, %v1384_v57 }
 0x282   :  { %v1392_v13 = vsel %vm1391_vm14, %v1390_v27, %v1388_v51 }
 0x283   :  { %1394 = vst [vmem:[#allocation8] sm:$0x1] %v1392_v13 }
 0x284   :  { %1405 = dma.vmem_to_hbm [thread:$0]  %s1401_s12, 16, %s1403_s15, [#allocation4]  }
 0x285   :  { %1635 = dma.done.wait [#allocation4], 16  }
 0x286   :  { %1636 = vsyncadd [#allocation4], 4294967280 }
 0x287   :  { %1410 = vsyncpa [#allocation3], 1 }
 0x288   :  { %1411 = vsyncpa [#allocation6], 1 }
 0x289   :  { %1412 = vsyncpa [#allocation4], 1 }

</bundles_post_ra>
